<compile_context>
chip_gen: v7x
topology: tpu7x:2x2x1
jax: 0.10.0
libtpu: 0.0.40
codegen_flags: <defaults>
</compile_context>

<pallas_src>
import functools

import jax
import jax.numpy as jnp
from jax import lax
from jax.experimental import pallas as pl
from jax.experimental.pallas import tpu as pltpu


def _down_kernel(x_ref, w1_ref, sh1_ref, w2_ref, sh2_ref, o_ref, p1_ref, p2_ref,
                 *, c_in, c_mid, c_out, hp, wp, down):
    f32 = jnp.float32
    wpc = wp * c_in

    # ---- MaxPool2d(down): VPU max over down*down contiguous blocks -------------
    # Input block layout (prepared by the wrapper):
    #   row  index = a * hp + i                (a = pooling row offset)
    #   lane index = b * wp*c_in + j*c_in + ci (b = pooling col offset)
    # Each (a, b) candidate is a contiguous static 2-D slice, and the pooled
    # result lands directly in the channels-last (hp, wp*c_in) layout the conv
    # stage consumes.  No MXU, no strided access, no reshapes.
    pooled = x_ref[0, 0:hp, 0:wpc].astype(f32)
    for a in range(down):
        for b in range(down):
            if a == 0 and b == 0:
                continue
            pooled = jnp.maximum(
                pooled,
                x_ref[0, a * hp:(a + 1) * hp, b * wpc:(b + 1) * wpc].astype(f32))

    # ---- Conv3x3 (pad=1, no bias) + folded-BN shift + ReLU as ONE matmul -------
    def conv_bn_relu(src, c, p_ref, w_ref, sh_ref):
        # src  : (hp, wp*c) channels-last activation (f32)
        # p_ref: (hp, 3*(wp+2)*c) row-im2col scratch; lane block `a` holds the
        #        zero-padded rows i+a-1 of src, so the whole 3x3 conv collapses
        #        into a single MXU matmul against a banded VMEM weight matrix
        #        (BN scale already folded into the weights by the wrapper).
        w3 = (wp + 2) * c
        p_ref[...] = jnp.zeros_like(p_ref)
        p_ref[1:hp, c:(wp + 1) * c] = src[0:hp - 1, :]                      # tap a=0 (row i-1)
        p_ref[0:hp, w3 + c:w3 + (wp + 1) * c] = src                         # tap a=1 (row i  )
        p_ref[0:hp - 1, 2 * w3 + c:2 * w3 + (wp + 1) * c] = src[1:hp, :]    # tap a=2 (row i+1)
        y = jnp.dot(p_ref[...], w_ref[...], preferred_element_type=f32,
                    precision=lax.Precision.HIGHEST)
        return jnp.maximum(y + sh_ref[...], 0.0)                            # BN shift + ReLU

    h1 = conv_bn_relu(pooled, c_in, p1_ref, w1_ref, sh1_ref)     # (hp, wp*c_mid)
    out = conv_bn_relu(h1, c_mid, p2_ref, w2_ref, sh2_ref)       # (hp, wp*c_out)
    o_ref[0, :, :] = out.astype(o_ref.dtype)


def _band_weight(w_folded, wp):
    """Banded weight matrix consumed by the row-im2col matmul.

    w_folded: (c_out_l, c_in_l, 3, 3) with BN scale already folded in.
    Returns W of shape (3*(wp+2)*c_in_l, wp*c_out_l) with
      W[a*(wp+2)*c + g*c + ci, j*c_out + co] = w_folded[co, ci, a, g - j]
      when 0 <= g - j <= 2, else 0.
    """
    c_out_l, c_in_l = w_folded.shape[:2]
    g = jnp.arange(wp + 2)
    j = jnp.arange(wp)
    b = jnp.arange(3)
    band = (g[:, None, None] == j[None, :, None] + b[None, None, :]).astype(w_folded.dtype)
    w_band = jnp.einsum('gjb,oiab->agijo', band, w_folded)        # (3, wp+2, c_in, wp, c_out)
    return w_band.reshape(3 * (wp + 2) * c_in_l, wp * c_out_l)


def down_forward(x, conv1_w, bn1, conv2_w, bn2, *, down=2, eps=1e-5):
    """x: (N, C_in, H, W) NCHW.  Returns (N, C_out, H//down, W//down) NCHW."""
    n, c_in, h, w = x.shape
    c_mid = conv1_w.shape[0]
    c_out = conv2_w.shape[0]
    assert conv1_w.shape == (c_mid, c_in, 3, 3)
    assert conv2_w.shape == (c_out, c_mid, 3, 3)
    assert h % down == 0 and w % down == 0
    hp, wp = h // down, w // down
    assert hp >= 2 and wp >= 1

    # Fold BN scale into the conv weights; keep only the shift for the kernel.
    def fold(bn, cw):
        gamma, beta, mean, var = bn
        scale = gamma / jnp.sqrt(var + eps)
        shift = beta - mean * scale
        return cw.astype(jnp.float32) * scale[:, None, None, None], shift.astype(jnp.float32)

    w1f, t1 = fold(bn1, conv1_w)
    w2f, t2 = fold(bn2, conv2_w)

    w1m = _band_weight(w1f, wp)                         # (3*(wp+2)*c_in,  wp*c_mid)
    w2m = _band_weight(w2f, wp)                         # (3*(wp+2)*c_mid, wp*c_out)
    sh1 = jnp.tile(t1, wp).reshape(1, wp * c_mid)       # lane order (j, co)
    sh2 = jnp.tile(t2, wp).reshape(1, wp * c_out)

    # Wrapper-side layout plumbing: rows = (a, i), lanes = (b, j, ci) so pooling
    # is contiguous slices + max and the result is already channels-last flat.
    x_k = x.reshape(n, c_in, hp, down, wp, down)
    x_k = jnp.transpose(x_k, (0, 3, 2, 5, 4, 1)).reshape(n, down * hp, down * wp * c_in)

    kernel = functools.partial(_down_kernel, c_in=c_in, c_mid=c_mid, c_out=c_out,
                               hp=hp, wp=wp, down=down)

    out = pl.pallas_call(
        kernel,
        out_shape=jax.ShapeDtypeStruct((n, hp, wp * c_out), x.dtype),
        grid_spec=pltpu.PrefetchScalarGridSpec(
            num_scalar_prefetch=0,
            grid=(n,),  # one image per step; batch axis shards across TCs on v7x
            in_specs=[
                pl.BlockSpec((1, down * hp, down * wp * c_in), lambda i: (i, 0, 0)),
                pl.BlockSpec(w1m.shape, lambda i: (0, 0)),   # conv1 banded weights (VMEM)
                pl.BlockSpec(sh1.shape, lambda i: (0, 0)),   # BN1 shift row
                pl.BlockSpec(w2m.shape, lambda i: (0, 0)),   # conv2 banded weights (VMEM)
                pl.BlockSpec(sh2.shape, lambda i: (0, 0)),   # BN2 shift row
            ],
            out_specs=pl.BlockSpec((1, hp, wp * c_out), lambda i: (i, 0, 0)),
            scratch_shapes=[
                pltpu.VMEM((hp, 3 * (wp + 2) * c_in), jnp.float32),   # row-im2col, layer 1
                pltpu.VMEM((hp, 3 * (wp + 2) * c_mid), jnp.float32),  # row-im2col, layer 2
            ],
        ),
        compiler_params=pltpu.CompilerParams(dimension_semantics=("parallel",)),
    )(x_k, w1m, sh1, w2m, sh2)

    # Back to NCHW.
    return out.reshape(n, hp, wp, c_out).transpose(0, 3, 1, 2)


class DownPallas:
    """Mirror of the PyTorch `Down` module (inference-mode BatchNorm)."""

    def __init__(self, in_channels, out_channels, down=2, eps=1e-5, *, key):
        mid_channels = out_channels  # DoubleConv default: mid = out
        self.down = down
        self.eps = eps
        k = jax.random.split(key, 8)
        self.conv1_w = jax.random.normal(k[0], (mid_channels, in_channels, 3, 3),
                                         jnp.float32) / jnp.sqrt(in_channels * 9.0)
        self.conv2_w = jax.random.normal(k[1], (out_channels, mid_channels, 3, 3),
                                         jnp.float32) / jnp.sqrt(mid_channels * 9.0)
        self.bn1 = (jax.random.uniform(k[2], (mid_channels,), jnp.float32, 0.5, 1.5),  # gamma
                    0.1 * jax.random.normal(k[3], (mid_channels,), jnp.float32),       # beta
                    0.1 * jax.random.normal(k[4], (mid_channels,), jnp.float32),       # running mean
                    jax.random.uniform(k[5], (mid_channels,), jnp.float32, 0.5, 1.5))  # running var
        self.bn2 = (jax.random.uniform(k[6], (out_channels,), jnp.float32, 0.5, 1.5),
                    0.1 * jax.random.normal(k[7], (out_channels,), jnp.float32),
                    jnp.zeros((out_channels,), jnp.float32),
                    jnp.ones((out_channels,), jnp.float32))

    def __call__(self, x):
        return down_forward(x, self.conv1_w, self.bn1, self.conv2_w, self.bn2,
                            down=self.down, eps=self.eps)


def _down_reference(x, conv1_w, bn1, conv2_w, bn2, *, down=2, eps=1e-5):
    """Pure-JAX reference matching the PyTorch forward (eval-mode BN)."""
    pooled = lax.reduce_window(x, -jnp.inf, lax.max,
                               (1, 1, down, down), (1, 1, down, down), "VALID")

    def conv(inp, wt):
        return lax.conv_general_dilated(inp, wt, (1, 1), ((1, 1), (1, 1)),
                                        dimension_numbers=("NCHW", "OIHW", "NCHW"),
                                        precision=lax.Precision.HIGHEST)

    def bn_relu(inp, bn):
        gamma, beta, mean, var = bn
        scale = gamma / jnp.sqrt(var + eps)
        shift = beta - mean * scale
        return jnp.maximum(inp * scale[None, :, None, None] + shift[None, :, None, None], 0.0)

    hidden = bn_relu(conv(pooled, conv1_w), bn1)
    return bn_relu(conv(hidden, conv2_w), bn2)


if __name__ == "__main__":
    key = jax.random.PRNGKey(0)
    k_param, k_x = jax.random.split(key)

    N, C_in, C_out, H, W = 2, 4, 8, 16, 16
    module = DownPallas(C_in, C_out, down=2, key=k_param)
    x = jax.random.normal(k_x, (N, C_in, H, W), jnp.float32)

    y = jax.block_until_ready(module(x))
    assert y.shape == (N, C_out, H // 2, W // 2), y.shape

    ref = _down_reference(x, module.conv1_w, module.bn1, module.conv2_w, module.bn2,
                          down=module.down, eps=module.eps)
    # Both paths run the conv contraction at Precision.HIGHEST; typical max
    # error is ~1e-6.  1e-4 still catches any bf16-truncation regression (~1e-2).
    max_err = float(jnp.max(jnp.abs(y - ref)))
    assert jnp.allclose(y, ref, atol=1e-4, rtol=1e-4), max_err

    print("KERNEL_OK")
</pallas_src>

<mosaic_0001>
module attributes {stable_mosaic.version = 11 : i64} {
  func.func @_down_kernel(%arg0: i32, %arg1: memref<1x16x64xf32, #tpu.memory_space<vmem>>, %arg2: memref<120x64xf32, #tpu.memory_space<vmem>>, %arg3: memref<1x64xf32, #tpu.memory_space<vmem>>, %arg4: memref<240x64xf32, #tpu.memory_space<vmem>>, %arg5: memref<1x64xf32, #tpu.memory_space<vmem>>, %arg6: memref<1x8x64xf32, #tpu.memory_space<vmem>>, %arg7: memref<8x120xf32, #tpu.memory_space<vmem>>, %arg8: memref<8x240xf32, #tpu.memory_space<vmem>>) attributes {dimension_semantics = [#tpu.dimension_semantics<parallel>], iteration_bounds = array<i64: 2>, scalar_prefetch = 0 : i64, scratch_operands = 2 : i64, tpu.core_type = #tpu.core_type<tc>, window_params = [{transform_indices = @transform_0, window_bounds = array<i64: 1, 16, 64>}, {pipeline_mode = #tpu.pipeline_mode<synchronous>, transform_indices = @transform_1, window_bounds = array<i64: 120, 64>}, {pipeline_mode = #tpu.pipeline_mode<synchronous>, transform_indices = @transform_2, window_bounds = array<i64: 1, 64>}, {pipeline_mode = #tpu.pipeline_mode<synchronous>, transform_indices = @transform_3, window_bounds = array<i64: 240, 64>}, {pipeline_mode = #tpu.pipeline_mode<synchronous>, transform_indices = @transform_4, window_bounds = array<i64: 1, 64>}, {transform_indices = @transform_5, window_bounds = array<i64: 1, 8, 64>}]} {
    %c0 = arith.constant 0 : index
    %c0_0 = arith.constant 0 : index
    %c0_1 = arith.constant 0 : index
    %0 = vector.load %arg1[%c0, %c0_0, %c0_1] : memref<1x16x64xf32, #tpu.memory_space<vmem>>, vector<1x8x32xf32>
    %1 = vector.shape_cast %0 : vector<1x8x32xf32> to vector<8x32xf32>
    %c0_2 = arith.constant 0 : index
    %c0_3 = arith.constant 0 : index
    %c32 = arith.constant 32 : index
    %2 = vector.load %arg1[%c0_2, %c0_3, %c32] : memref<1x16x64xf32, #tpu.memory_space<vmem>>, vector<1x8x32xf32>
    %3 = vector.shape_cast %2 : vector<1x8x32xf32> to vector<8x32xf32>
    %4 = arith.maximumf %1, %3 : vector<8x32xf32>
    %c0_4 = arith.constant 0 : index
    %c8 = arith.constant 8 : index
    %c0_5 = arith.constant 0 : index
    %5 = vector.load %arg1[%c0_4, %c8, %c0_5] : memref<1x16x64xf32, #tpu.memory_space<vmem>>, vector<1x8x32xf32>
    %6 = vector.shape_cast %5 : vector<1x8x32xf32> to vector<8x32xf32>
    %7 = arith.maximumf %4, %6 : vector<8x32xf32>
    %c0_6 = arith.constant 0 : index
    %c8_7 = arith.constant 8 : index
    %c32_8 = arith.constant 32 : index
    %8 = vector.load %arg1[%c0_6, %c8_7, %c32_8] : memref<1x16x64xf32, #tpu.memory_space<vmem>>, vector<1x8x32xf32>
    %9 = vector.shape_cast %8 : vector<1x8x32xf32> to vector<8x32xf32>
    %10 = arith.maximumf %7, %9 : vector<8x32xf32>
    %cst = arith.constant 0.000000e+00 : f32
    %11 = vector.broadcast %cst : f32 to vector<8x120xf32>
    %c0_9 = arith.constant 0 : index
    %c0_10 = arith.constant 0 : index
    %12 = vector.load %arg7[%c0_9, %c0_10] : memref<8x120xf32, #tpu.memory_space<vmem>>, vector<8x120xf32>
    tpu.vector_store %arg7[%c0_9, %c0_10], %11 {strides = array<i32>} : memref<8x120xf32, #tpu.memory_space<vmem>>, vector<8x120xf32>,
    %13 = vector.extract_strided_slice %10 {offsets = [0, 0], sizes = [7, 32], strides = [1, 1]} : vector<8x32xf32> to vector<7x32xf32>
    %c1 = arith.constant 1 : index
    %c4 = arith.constant 4 : index
    %14 = vector.load %arg7[%c1, %c4] : memref<8x120xf32, #tpu.memory_space<vmem>>, vector<7x32xf32>
    tpu.vector_store %arg7[%c1, %c4], %13 {strides = array<i32>} : memref<8x120xf32, #tpu.memory_space<vmem>>, vector<7x32xf32>,
    %c0_11 = arith.constant 0 : index
    %c44 = arith.constant 44 : index
    %15 = vector.load %arg7[%c0_11, %c44] : memref<8x120xf32, #tpu.memory_space<vmem>>, vector<8x32xf32>
    tpu.vector_store %arg7[%c0_11, %c44], %10 {strides = array<i32>} : memref<8x120xf32, #tpu.memory_space<vmem>>, vector<8x32xf32>,
    %16 = vector.extract_strided_slice %10 {offsets = [1, 0], sizes = [7, 32], strides = [1, 1]} : vector<8x32xf32> to vector<7x32xf32>
    %c0_12 = arith.constant 0 : index
    %c84 = arith.constant 84 : index
    %17 = vector.load %arg7[%c0_12, %c84] : memref<8x120xf32, #tpu.memory_space<vmem>>, vector<7x32xf32>
    tpu.vector_store %arg7[%c0_12, %c84], %16 {strides = array<i32>} : memref<8x120xf32, #tpu.memory_space<vmem>>, vector<7x32xf32>,
    %c0_13 = arith.constant 0 : index
    %c0_14 = arith.constant 0 : index
    %18 = vector.load %arg7[%c0_13, %c0_14] : memref<8x120xf32, #tpu.memory_space<vmem>>, vector<8x120xf32>
    %c0_15 = arith.constant 0 : index
    %c0_16 = arith.constant 0 : index
    %19 = vector.load %arg2[%c0_15, %c0_16] : memref<120x64xf32, #tpu.memory_space<vmem>>, vector<120x64xf32>
    %cst_17 = arith.constant dense<0.000000e+00> : vector<8x64xf32>
    %20 = tpu.matmul %18, %19, %cst_17 {dimension_numbers = #tpu.dot_dimension_numbers<[1], [0], [0], [1], [0, 0, 1, 1], [], []>, precision = #tpu.contract_precision<fp32>} : vector<8x120xf32>, vector<120x64xf32>, vector<8x64xf32> -> vector<8x64xf32>
    %c0_18 = arith.constant 0 : index
    %c0_19 = arith.constant 0 : index
    %21 = vector.load %arg3[%c0_18, %c0_19] : memref<1x64xf32, #tpu.memory_space<vmem>>, vector<1x64xf32>
    %22 = vector.broadcast %21 : vector<1x64xf32> to vector<8x64xf32>
    %23 = arith.addf %20, %22 : vector<8x64xf32>
    %cst_20 = arith.constant 0.000000e+00 : f32
    %24 = vector.broadcast %cst_20 : f32 to vector<8x64xf32>
    %25 = arith.maximumf %23, %24 : vector<8x64xf32>
    %cst_21 = arith.constant 0.000000e+00 : f32
    %26 = vector.broadcast %cst_21 : f32 to vector<8x240xf32>
    %c0_22 = arith.constant 0 : index
    %c0_23 = arith.constant 0 : index
    %27 = vector.load %arg8[%c0_22, %c0_23] : memref<8x240xf32, #tpu.memory_space<vmem>>, vector<8x240xf32>
    tpu.vector_store %arg8[%c0_22, %c0_23], %26 {strides = array<i32>} : memref<8x240xf32, #tpu.memory_space<vmem>>, vector<8x240xf32>,
    %28 = vector.extract_strided_slice %25 {offsets = [0, 0], sizes = [7, 64], strides = [1, 1]} : vector<8x64xf32> to vector<7x64xf32>
    %c1_24 = arith.constant 1 : index
    %c8_25 = arith.constant 8 : index
    %29 = vector.load %arg8[%c1_24, %c8_25] : memref<8x240xf32, #tpu.memory_space<vmem>>, vector<7x64xf32>
    tpu.vector_store %arg8[%c1_24, %c8_25], %28 {strides = array<i32>} : memref<8x240xf32, #tpu.memory_space<vmem>>, vector<7x64xf32>,
    %c0_26 = arith.constant 0 : index
    %c88 = arith.constant 88 : index
    %30 = vector.load %arg8[%c0_26, %c88] : memref<8x240xf32, #tpu.memory_space<vmem>>, vector<8x64xf32>
    tpu.vector_store %arg8[%c0_26, %c88], %25 {strides = array<i32>} : memref<8x240xf32, #tpu.memory_space<vmem>>, vector<8x64xf32>,
    %31 = vector.extract_strided_slice %25 {offsets = [1, 0], sizes = [7, 64], strides = [1, 1]} : vector<8x64xf32> to vector<7x64xf32>
    %c0_27 = arith.constant 0 : index
    %c168 = arith.constant 168 : index
    %32 = vector.load %arg8[%c0_27, %c168] : memref<8x240xf32, #tpu.memory_space<vmem>>, vector<7x64xf32>
    tpu.vector_store %arg8[%c0_27, %c168], %31 {strides = array<i32>} : memref<8x240xf32, #tpu.memory_space<vmem>>, vector<7x64xf32>,
    %c0_28 = arith.constant 0 : index
    %c0_29 = arith.constant 0 : index
    %33 = vector.load %arg8[%c0_28, %c0_29] : memref<8x240xf32, #tpu.memory_space<vmem>>, vector<8x240xf32>
    %c0_30 = arith.constant 0 : index
    %c0_31 = arith.constant 0 : index
    %34 = vector.load %arg4[%c0_30, %c0_31] : memref<240x64xf32, #tpu.memory_space<vmem>>, vector<240x64xf32>
    %cst_32 = arith.constant dense<0.000000e+00> : vector<8x64xf32>
    %35 = tpu.matmul %33, %34, %cst_32 {dimension_numbers = #tpu.dot_dimension_numbers<[1], [0], [0], [1], [0, 0, 1, 1], [], []>, precision = #tpu.contract_precision<fp32>} : vector<8x240xf32>, vector<240x64xf32>, vector<8x64xf32> -> vector<8x64xf32>
    %c0_33 = arith.constant 0 : index
    %c0_34 = arith.constant 0 : index
    %36 = vector.load %arg5[%c0_33, %c0_34] : memref<1x64xf32, #tpu.memory_space<vmem>>, vector<1x64xf32>
    %37 = vector.broadcast %36 : vector<1x64xf32> to vector<8x64xf32>
    %38 = arith.addf %35, %37 : vector<8x64xf32>
    %cst_35 = arith.constant 0.000000e+00 : f32
    %39 = vector.broadcast %cst_35 : f32 to vector<8x64xf32>
    %40 = arith.maximumf %38, %39 : vector<8x64xf32>
    %c0_36 = arith.constant 0 : index
    %c0_37 = arith.constant 0 : index
    %c0_38 = arith.constant 0 : index
    %41 = vector.load %arg6[%c0_36, %c0_37, %c0_38] : memref<1x8x64xf32, #tpu.memory_space<vmem>>, vector<1x8x64xf32>
    %42 = vector.shape_cast %41 : vector<1x8x64xf32> to vector<8x64xf32>
    %43 = vector.shape_cast %40 : vector<8x64xf32> to vector<1x8x64xf32>
    tpu.vector_store %arg6[%c0_36, %c0_37, %c0_38], %43 {strides = array<i32>} : memref<1x8x64xf32, #tpu.memory_space<vmem>>, vector<1x8x64xf32>,
    return
  }
  func.func @transform_0(%arg0: i32) -> (i32, i32, i32) {
    %c0_i32 = arith.constant 0 : i32
    %c0_i32_0 = arith.constant 0 : i32
    %c0_i32_1 = arith.constant 0 : i32
    return %arg0, %c0_i32, %c0_i32_0 : i32, i32, i32
  }
  func.func @transform_1(%arg0: i32) -> (i32, i32) {
    %c0_i32 = arith.constant 0 : i32
    %c0_i32_0 = arith.constant 0 : i32
    %c0_i32_1 = arith.constant 0 : i32
    return %c0_i32, %c0_i32_0 : i32, i32
  }
  func.func @transform_2(%arg0: i32) -> (i32, i32) {
    %c0_i32 = arith.constant 0 : i32
    %c0_i32_0 = arith.constant 0 : i32
    %c0_i32_1 = arith.constant 0 : i32
    return %c0_i32, %c0_i32_0 : i32, i32
  }
  func.func @transform_3(%arg0: i32) -> (i32, i32) {
    %c0_i32 = arith.constant 0 : i32
    %c0_i32_0 = arith.constant 0 : i32
    %c0_i32_1 = arith.constant 0 : i32
    return %c0_i32, %c0_i32_0 : i32, i32
  }
  func.func @transform_4(%arg0: i32) -> (i32, i32) {
    %c0_i32 = arith.constant 0 : i32
    %c0_i32_0 = arith.constant 0 : i32
    %c0_i32_1 = arith.constant 0 : i32
    return %c0_i32, %c0_i32_0 : i32, i32
  }
  func.func @transform_5(%arg0: i32) -> (i32, i32, i32) {
    %c0_i32 = arith.constant 0 : i32
    %c0_i32_0 = arith.constant 0 : i32
    %c0_i32_1 = arith.constant 0 : i32
    return %arg0, %c0_i32, %c0_i32_0 : i32, i32, i32
  }
}

</mosaic_0001>

<bundles_post_ra>
// kernel: tpu_custom_call.1
= control target key start
LH: loop header
LB: loop body
LE: loop exit
PB: predicated region body
PF: predicated region fallthrough
CT: control target
= control target key end

     0   :  { %10 = vsyncpa [#allocation5], 0  ;;  %s3826_s0 = inlined_call_operand.vmem [shape: f32[2,16,64], index: 0, kind: input, shape index: {}]   ;;  %s3827_s1 = inlined_call_operand.vmem [shape: f32[120,64], index: 1, kind: input, shape index: {}]   ;;  %s3828_s2 = inlined_call_operand.vmem [shape: f32[1,64], index: 2, kind: input, shape index: {}]   ;;  %s3829_s3 = inlined_call_operand.vmem [shape: f32[240,64], index: 3, kind: input, shape index: {}]   ;;  %s3830_s4 = inlined_call_operand.vmem [shape: f32[1,64], index: 4, kind: input, shape index: {}]   ;;  %s3831_s5 = inlined_call_operand.hbm [shape: f32[2,8,64], index: 5, kind: output, shape index: {}]  }
   0x1   :  { %12 = vsyncpa [#allocation5 + $0x1], 0  ;;  %s2765_s18 = smov 0   ;;  %s2767_s19 = smov 0  }
   0x2   :  { %s2769_s20 = smov 0   ;;  %s2771_s21 = smov 0  }
   0x3 LB: > { %s2786_s22 = sadd.s32 4294967295, %s2722_s21   ;;  %s1886_s23 = sadd.s32 4294967294, %s2722_s21   ;;  %s2722_s21 = sphi %s2771_s21, %s3895_s21   ;;  %s2718_s20 = sphi %s2769_s20, %s3894_s20   ;;  %s2714_s19 = sphi %s2767_s19, %s3893_s19   ;;  %s2710_s18 = sphi %s2765_s18, %s3892_s18  }
   0x4   : > { %s2790_s24 = sadd.s32 1, %s2722_s21   ;;  %s135_s25 = sadd.s32 1, %s2718_s20 }
   0x5   : > { %s132_s26 = ssub.s32 %s2722_s21, %s2790_s24  ;;  %p145_p0 = scmp.ne.s32.totalorder %s2718_s20, %s2714_s19 }
   0x6   : > { %p133_p1 = scmp.eq.s32.totalorder %s132_s26, 0  ;;  %p146_p2 = scmp.eq.s32.totalorder %s2786_s22, 1 }
   0x7   : > { %p151_p3 = scmp.ne.s32.totalorder %s2714_s19, %s2710_s18  ;;  %p152_p4 = scmp.eq.s32.totalorder %s1886_s23, 1 }
   0x8   : > { %s2801_s27 = scalar_select %p133_p1, %s2718_s20, %s135_s25  }
   0x9   : > { %p2803_p5 = por %p146_p2, %p145_p0  ;;  %p2807_p6 = por %p152_p4, %p151_p3 }
   0xa   : > { %p1889_p7 = scmp.ge.s32.totalorder %s2722_s21, 1  ;;  %p190_p8 = scmp.lt.s32.totalorder %s2722_s21, 3 }
   0xc   : > { %p191_p9 = pnand %p1889_p7, %p190_p8 }
   0xd   : > { %p218_p10 = scmp.lt.s32.totalorder (!%p191_p9), %s2786_s22, 1  ;;  %v255_v0 = vld [vmem:[%s3827_s1] sm:$0xff] (!%p191_p9)  ;;  %v256_v1 = vld [vmem:[%s3827_s1 + $0x8] sm:$0xff] (!%p191_p9)  ;;  %v257_v2 = vld [vmem:[%s3827_s1 + $0x10] sm:$0xff] (!%p191_p9)  ;;  %v2724_v3 = vmov (!%p191_p9), 0.0|0.0   ;;  %s2725_s23 = smov (!%p191_p9), 96  }
   0xe   : > { %194 = sbr.rel (%p191_p9) target bundleno = 1252 (0x4e4), region = 40  ;;  %2194 = vmatprep.subr.bf16.mxu0 (!%p191_p9), %v2724_v3  ;;  %v281_v4 = vand.u32 (!%p191_p9), 4294901760, %v255_v0  ;;  %v284_v5 = vand.u32 (!%p191_p9), 4294901760, %v256_v1  ;;  %v258_v6 = vld [vmem:[%s3827_s1 + $0x18] sm:$0xff] (!%p191_p9)  ;;  %v287_v7 = vand.u32 (!%p191_p9), 4294901760, %v257_v2  ;;  %2365 = vmatprep.subr.bf16.mxu1 (!%p191_p9), %v2724_v3  ;;  %v259_v17 = vld [vmem:[%s3827_s1 + $0x20] sm:$0xff] (!%p191_p9) }
   0xf   : > { %v290_v9 = vand.u32 (!%p191_p9), 4294901760, %v258_v6  ;;  %v260_v18 = vld [vmem:[%s3827_s1 + $0x28] sm:$0xff] (!%p191_p9)  ;;  %vm236_vm0 = vcmask (!%p191_p9), 982016   ;;  %v293_v19 = vand.u32 (!%p191_p9), 4294901760, %v259_v17  ;;  %v2726_v21 = vmov (!%p191_p9), 0.0   ;;  %v261_v25 = vld [vmem:[%s3827_s1 + $0x30] sm:$0xff] (!%p191_p9) }
  0x10   : > { %v2832_v10 = vpack.c.bf16 (!%p191_p9), %v284_v5, %v281_v4  ;;  %v2834_v11 = vsub.f32 (!%p191_p9), %v255_v0, %v281_v4  ;;  %v2836_v12 = vsub.f32 (!%p191_p9), %v256_v1, %v284_v5  ;;  %v2838_v13 = vsub.f32 (!%p191_p9), %v257_v2, %v287_v7  ;;  %237 = vst.msk [vmem:[#allocation2] sm:$0xff] (!%p191_p9), %vm236_vm0, %v2726_v21  ;;  %v262_v26 = vld [vmem:[%s3827_s1 + $0x38] sm:$0xff] (!%p191_p9)  ;;  %v263_v32 = vld [vmem:[%s3827_s1 + $0x40] sm:$0xff] (!%p191_p9)  ;;  %v264_v33 = vld [vmem:[%s3827_s1 + $0x48] sm:$0xff] (!%p191_p9)  ;;  %s2728_s7 = smov (!%p191_p9), 84   ;;  %s2729_s8 = smov (!%p191_p9), 4  }
  0x11   : > { %v2840_v15 = vsub.f32 (!%p191_p9), %v258_v6, %v290_v9  ;;  %v2843_v16 = vpack.c.bf16 (!%p191_p9), %v290_v9, %v287_v7  ;;  %v296_v20 = vand.u32 (!%p191_p9), 4294901760, %v260_v18  ;;  %909 = vst [vmem:[#allocation3] sm:$0xff] (!%p191_p9), %v2726_v21  ;;  %v2859_v23 = vsub.f32 (!%p191_p9), %v259_v17, %v293_v19  ;;  %v265_v34 = vld [vmem:[%s3827_s1 + $0x50] sm:$0xff] (!%p191_p9)  ;;  %v266_v38 = vld [vmem:[%s3827_s1 + $0x58] sm:$0xff] (!%p191_p9)  ;;  %v267_v40 = vld [vmem:[%s3827_s1 + $0x60] sm:$0xff] (!%p191_p9)  ;;  %s2730_s11 = smov (!%p191_p9), 44  }
  0x12   : > { %2196 = vmatpush3.bf16.msra.mxu0 (!%p191_p9), %v2832_v10  ;;  %v299_v27 = vand.u32 (!%p191_p9), 4294901760, %v261_v25  ;;  %v302_v28 = vand.u32 (!%p191_p9), 4294901760, %v262_v26  ;;  %v305_v36 = vand.u32 (!%p191_p9), 4294901760, %v263_v32  ;;  %v308_v37 = vand.u32 (!%p191_p9), 4294901760, %v264_v33  ;;  %v268_v41 = vld [vmem:[%s3827_s1 + $0x68] sm:$0xff] (!%p191_p9)  ;;  %v2924_v58 = vld [vmem:[%s3827_s1 + $0x70] sm:$0xff] (!%p191_p9) }
  0x13   : > { %2197 = vmatprep.subr.bf16.mxu0 (!%p191_p9), %v2724_v3  ;;  %v2857_v22 = vpack.c.bf16 (!%p191_p9), %v296_v20, %v293_v19  ;;  %v2861_v24 = vsub.f32 (!%p191_p9), %v260_v18, %v296_v20  ;;  %v311_v39 = vand.u32 (!%p191_p9), 4294901760, %v265_v34  ;;  %vm2727_vm1 = vmmov (!%p191_p9), 0   ;;  %s2731_s10 = smov (!%p191_p9), 88   ;;  %s2733_s12 = smov (!%p191_p9), 8  }
  0x14   : > { %v2871_v29 = vpack.c.bf16 (!%p191_p9), %v302_v28, %v299_v27  ;;  %v2873_v30 = vsub.f32 (!%p191_p9), %v261_v25, %v299_v27  ;;  %v2875_v31 = vsub.f32 (!%p191_p9), %v262_v26, %v302_v28  ;;  %2026 = vmatprep.mubr.msk.f32.mxu0 (!%p191_p9), %vm2727_vm1, %v2726_v21  ;;  %v314_v43 = vand.u32 (!%p191_p9), 4294901760, %v266_v38  ;;  %s215_s13 = sand.u32 (!%p191_p9), 1, %s2714_s19   ;;  %s1896_s17 = sshll.u32 (!%p191_p9), %s2786_s22, 7 }
  0x15   : > { %s219_s30 = scalar_select %p218_p10, %s2786_s22, 1  ;;  %v317_v44 = vand.u32 4294901760, %v267_v40  ;;  %v320_v45 = vand.u32 4294901760, %v268_v41  ;;  %v2899_v46 = vpack.c.bf16 %v308_v37, %v305_v36  ;;  %v2901_v47 = vsub.f32 %v263_v32, %v305_v36 }
  0x16   : > { %2199 = vmatpush3.bf16.msra.mxu0 %v2843_v16  ;;  %v2903_v48 = vsub.f32 %v264_v33, %v308_v37  ;;  %v2905_v49 = vsub.f32 %v265_v34, %v311_v39  ;;  %v2907_v51 = vsub.f32 %v266_v38, %v314_v43  ;;  %v2910_v53 = vpack.c.bf16 %v314_v43, %v311_v39  ;;  %s1890_s14 = sshll.u32 %s215_s13, 3  ;;  %s2734_s22 = smov [#allocation4]  }
  0x17   : > { %s1899_s6 = sshll.u32 %s219_s30, 4  ;;  %2200 = vmatprep.subr.bf16.mxu0 %v2724_v3  ;;  %v2912_v54 = vsub.f32 %v267_v40, %v317_v44  ;;  %v2914_v55 = vsub.f32 %v268_v41, %v320_v45  ;;  %v2918_v57 = vpack.c.bf16 %v320_v45, %v317_v44  ;;  %v373_v59 = vand.u32 4294901760, %v2834_v11  ;;  %s2664_s9 = sshll.u32 %s2734_s22, 4  ;;  %s2665_s9 = int_to_ptr.vmem [resolvable:$false] %s2664_s9 }
  0x18   : > { %s222_s15 = scalar_lea.vmem %s3826_s0, %s1899_s6  ;;  %v380_v60 = vand.u32 4294901760, %v2836_v12  ;;  %v2930_v61 = vand.u32 4294901760, %v2924_v58  ;;  %v387_v2 = vand.u32 4294901760, %v2838_v13  ;;  %v394_v4 = vand.u32 4294901760, %v2840_v15  ;;  %s3784_s6 = scalar_lea.hbm %s3831_s5, %s1896_s17 }
  0x19   : > { %v223_v8 = vld [vmem:[%s222_s15] sm:$0xff]  ;;  %v229_v14 = vld [vmem:[%s222_s15 + $0x8] sm:$0xff]  ;;  %v374_v62 = vsub.f32 %v2834_v11, %v373_v59  ;;  %v408_v17 = vand.u32 4294901760, %v2861_v24  ;;  %v415_v27 = vand.u32 4294901760, %v2873_v30  ;;  %v422_v28 = vand.u32 4294901760, %v2875_v31 }
  0x1a   : > { %225 = vrot.lane.b32.xlu0 %v223_v8, %s2725_s23  ;;  %2202 = vmatpush3.bf16.msra.mxu0 %v2857_v22  ;;  %v381_v63 = vsub.f32 %v2836_v12, %v380_v60  ;;  %v388_v6 = vsub.f32 %v2838_v13, %v387_v2  ;;  %v395_v7 = vsub.f32 %v2840_v15, %v394_v4  ;;  %v429_v37 = vand.u32 4294901760, %v2901_v47 }
  0x1b   : > { %2203 = vmatprep.subr.bf16.mxu0 %v2724_v3  ;;  %v375_v0 = vand.u32 4294901760, %v374_v62  ;;  %v409_v20 = vsub.f32 %v2861_v24, %v408_v17  ;;  %v416_v33 = vsub.f32 %v2873_v30, %v415_v27  ;;  %v423_v34 = vsub.f32 %v2875_v31, %v422_v28 }
  0x1c   : > { %v382_v1 = vand.u32 4294901760, %v381_v63  ;;  %v396_v9 = vand.u32 4294901760, %v395_v7  ;;  %v436_v38 = vand.u32 4294901760, %v2903_v48  ;;  %v430_v40 = vsub.f32 %v2901_v47, %v429_v37 }
  0x1d   : > { %v410_v26 = vand.u32 4294901760, %v409_v20  ;;  %v424_v36 = vand.u32 4294901760, %v423_v34  ;;  %v443_v44 = vand.u32 4294901760, %v2905_v49  ;;  %v450_v45 = vand.u32 4294901760, %v2907_v51 }
  0x1e   : > { %232 = vrot.lane.b32.xlu0 %v229_v14, %s2725_s23  ;;  %2205 = vmatpush3.bf16.msra.mxu0 %v2871_v29  ;;  %v2942_v5 = vpack.c.bf16 %v382_v1, %v375_v0  ;;  %v437_v41 = vsub.f32 %v2903_v48, %v436_v38  ;;  %v457_v0 = vand.u32 4294901760, %v2912_v54  ;;  %v464_v1 = vand.u32 4294901760, %v2914_v55  ;;  %s217_s23 = scalar_lea.vmem [#allocation4], %s1890_s14 }
  0x1f   : > { %2206 = vmatprep.subr.bf16.mxu0 %v2724_v3  ;;  %v2246_v34 = vpack.c.bf16 %v2875_v31, %v2873_v30  ;;  %vm242_vm2 = vcmask 292896   ;;  %vm247_vm3 = vcmask 621920   ;;  %vm252_vm4 = vcmask 949921   ;;  %v937_v30 = vld [vmem:[%s3829_s3 + $0x18] sm:$0xff]  ;;  %s1827_s25 = sshll.u32 %s217_s23, 4  ;;  %s3786_s25 = int_to_ptr.vmem [resolvable:$true] %s1827_s25 }
  0x20   : > { %v438_v43 = vand.u32 4294901760, %v437_v41  ;;  %v458_v7 = vsub.f32 %v2912_v54, %v457_v0  ;;  %vm910_vm5 = vcmask 916480   ;;  %vm924_vm6 = vcmask 195584   ;;  %p2667_p0 = scmp.lt.s32.totalorder %s3786_s25, %s2665_s9 }
  0x21   : > { %911 = vst.msk [vmem:[#allocation3 + $0x8] sm:$0xff] %vm910_vm5, %v2726_v21  ;;  %vm930_vm7 = vcmask 850240   ;;  %vm917_vm8 = vcmask 588865   ;;  %vm922_vm9 = vcmask 1048256   ;;  %vm1811_vm10 = vcmask 523264  }
  0x22   : > { %2208 = vmatpush3.bf16.msra.mxu0 %v2899_v46 }
  0x23   : > { %2209 = vmatprep.subr.bf16.mxu0 %v2724_v3 }
  0x26   : > { %2211 = vmatpush3.bf16.msra.mxu0 %v2910_v53 }
  0x27   : > { %2212 = vmatprep.subr.bf16.mxu0 %v2724_v3 }
  0x2a   : > { %2214 = vmatpush3.bf16.msra.mxu0 %v2918_v57 }
  0x2b   : > { %2024 = vmatprep.subr.mxu0 %v2726_v21 }
  0x2e   : > { %2025 = vmatpush3.msra.mxu0 %v2930_v61 }
  0x2f   : > { %2215 = vmatprep.subr.bf16.mxu0 %v2724_v3 }
  0x8c   : > { %v226_v35 = vpop.permute.xlu0 %225 }
  0x8d   : > { %v228_v42 = vmax.f32 %v223_v8, %v226_v35  ;;  %v389_v8 = vand.u32 4294901760, %v388_v6  ;;  %v417_v35 = vand.u32 4294901760, %v416_v33  ;;  %v2243_v33 = vpack.c.bf16 %v2861_v24, %v2859_v23 }
  0x8f   : > { %v230_v50 = vmax.f32 %v228_v42, %v229_v14  ;;  %v401_v14 = vand.u32 4294901760, %v2859_v23  ;;  %v2219_v18 = vpack.c.bf16 %v396_v9, %v389_v8  ;;  %v2225_v39 = vpack.c.bf16 %v424_v36, %v417_v35 }
  0x90   : > { %v233_v52 = vpop.permute.xlu0 %232  ;;  %v431_v42 = vand.u32 4294901760, %v430_v40  ;;  %v465_v8 = vsub.f32 %v2914_v55, %v464_v1  ;;  %v459_v9 = vand.u32 4294901760, %v458_v7  ;;  %v2249_v35 = vpack.c.bf16 %v2903_v48, %v2901_v47  ;;  %v939_v47 = vld [vmem:[%s3829_s3 + $0x28] sm:$0xff] }
  0x91   : > { %v235_v56 = vmax.f32 %v230_v50, %v233_v52  ;;  %v402_v19 = vsub.f32 %v2859_v23, %v401_v14  ;;  %v444_v52 = vsub.f32 %v2905_v49, %v443_v44  ;;  %v2252_v36 = vpack.c.bf16 %v2907_v51, %v2905_v49 }
  0x92   : > { %v2228_v50 = vpack.c.bf16 %v438_v43, %v431_v42  ;;  %v2255_v40 = vpack.c.bf16 %v2914_v55, %v2912_v54  ;;  %v2297_v23 = vpack.c.bf16 %v464_v1, %v457_v0  ;;  %v984_v48 = vand.u32 4294901760, %v937_v30  ;;  %v3146_v54 = vld [vmem:[%s3829_s3 + $0x38] sm:$0xff] }
  0x93   : > { %249 = vrot.lane.b32.xlu0 %v235_v56, %s2728_s7  ;;  %239 = vrot.lane.b32.xlu1 %v235_v56, %s2729_s8  ;;  %v403_v25 = vand.u32 4294901760, %v402_v19  ;;  %v445_v62 = vand.u32 4294901760, %v444_v52  ;;  %v466_v19 = vand.u32 4294901760, %v465_v8  ;;  %s1814_s7 = scalar_lea.sflag [#allocation5], %s215_s13  ;;  %s2660_s8 = scalar_lea.vmem %s3786_s25, 128 }
  0x94   : > { %p2661_p11 = scmp.ne.s32.totalorder %s3786_s25, %s2660_s8 }
  0x95   : > { %v2222_v32 = vpack.c.bf16 %v410_v26, %v403_v25  ;;  %v2234_v20 = vpack.c.bf16 %v466_v19, %v459_v9  ;;  %v2237_v25 = vpack.c.bf16 %v2836_v12, %v2834_v11  ;;  %v2240_v26 = vpack.c.bf16 %v2840_v15, %v2838_v13 }
  0x96   : > { %v3017_v19 = vsub.f32 %v2924_v58, %v2930_v61  ;;  %v2279_v58 = vpack.c.bf16 %v380_v60, %v373_v59  ;;  %v2285_v11 = vpack.c.bf16 %v408_v17, %v401_v14  ;;  %v2288_v12 = vpack.c.bf16 %v422_v28, %v415_v27  ;;  %p2662_p12 = pnand %p2661_p11, %p2803_p5 }
  0x97   : > { %244 = vrot.lane.b32.xlu1 %v235_v56, %s2730_s11  ;;  %v451_v56 = vsub.f32 %v2907_v51, %v450_v45  ;;  %v2291_v13 = vpack.c.bf16 %v436_v38, %v429_v37  ;;  %v2294_v15 = vpack.c.bf16 %v450_v45, %v443_v44  ;;  %v990_v51 = vand.u32 4294901760, %v939_v47  ;;  %s2732_s11 = smov 40  }
  0x98   : > { %v3156_v60 = vsub.f32 %v937_v30, %v984_v48  ;;  %v996_v28 = vand.u32 4294901760, %v3146_v54  ;;  %p2663_p13 = pneg %p2662_p12 }
  0x99   : > { %v452_v63 = vand.u32 4294901760, %v451_v56 }
  0x9a   : > { %v3850_v37 = vand.u32 4294901760, %v3156_v60 }
  0x9b   : > { %v2231_v6 = vpack.c.bf16 %v452_v63, %v445_v62 }
 0x105   : > { %v240_v41 = vpop.permute.xlu1 %239  ;;  %v250_v43 = vpop.permute.xlu0 %249 }
 0x106   : > { %243 = vst.msk [vmem:[#allocation2 + $0x1] sm:$0x7f] %vm242_vm2, %v240_v41 }
 0x109   : > { %v245_v42 = vpop.permute.xlu1 %244 }
 0x10a   : > { %248 = vst.msk [vmem:[#allocation2] sm:$0xff] %vm247_vm3, %v245_v42  ;;  %v943_v42 = vld [vmem:[%s3829_s3 + $0x48] sm:$0xff] }
 0x10b   : > { %253 = vst.msk [vmem:[#allocation2 - $0x1] sm:$0xfe] %vm252_vm4, %v250_v43 }
 0x112   : > { %v254_v52 = vld [vmem:[#allocation2] sm:$0xff] }
 0x113   : > { %v278_v56 = vsel %vm236_vm0, %v254_v52, 0 }
 0x114   : > { %v3006_v62 = vand.u32 4294901760, %v278_v56 }
 0x116   : > { %v361_v63 = vsub.f32 %v278_v56, %v3006_v62 }
 0x118   : > { %v362_v7 = vand.u32 4294901760, %v361_v63 }
 0x11a   : > { %v363_v8 = vsub.f32 %v361_v63, %v362_v7 }
 0x11c   : > { %v364_v9 = vand.u32 4294901760, %v363_v8 }
 0x11e   : > { %2027 = vmatmul.mubr.f32.vlgmr.msra.gmra.mrb[0].mxu0 %v364_v9 }
 0x11f   : > { %2217 = vmatpush3.bf16.msra.mxu0 %v2942_v5  ;;  %2059 = vmatprep.mubr.msk.f32.mxu0 %vm2727_vm1, %v2726_v21  ;;  %v471_v5 = vand.u32 4294901760, %v3017_v19 }
 0x120   : > { %2218 = vmatprep.subr.bf16.mxu0 %v2724_v3 }
 0x123   : > { %2220 = vmatpush3.bf16.msra.mxu0 %v2219_v18  ;;  %v472_v18 = vsub.f32 %v3017_v19, %v471_v5 }
 0x124   : > { %2221 = vmatprep.subr.bf16.mxu0 %v2724_v3 }
 0x127   : > { %2223 = vmatpush3.bf16.msra.mxu0 %v2222_v32  ;;  %v473_v32 = vand.u32 4294901760, %v472_v18  ;;  %v3228_v18 = vld [vmem:[%s3829_s3 + $0x60] sm:$0xff] }
 0x128   : > { %2224 = vmatprep.subr.bf16.mxu0 %v2724_v3 }
 0x12b   : > { %2226 = vmatpush3.bf16.msra.mxu0 %v2225_v39  ;;  %v2282_v39 = vpack.c.bf16 %v394_v4, %v387_v2  ;;  %v3160_v2 = vsub.f32 %v939_v47, %v990_v51  ;;  %v3261_v47 = vld [vmem:[%s3829_s3 + $0x78] sm:$0xff] }
 0x12c   : > { %2227 = vmatprep.subr.bf16.mxu0 %v2724_v3 }
 0x12d   : > { %v3844_v44 = vand.u32 4294901760, %v3160_v2 }
 0x12f   : > { %2229 = vmatpush3.bf16.msra.mxu0 %v2228_v50 }
 0x130   : > { %2230 = vmatprep.subr.bf16.mxu0 %v2724_v3 }
 0x133   : > { %2232 = vmatpush3.bf16.msra.mxu0 %v2231_v6  ;;  %v3185_v6 = vsub.f32 %v3146_v54, %v996_v28 }
 0x134   : > { %2233 = vmatprep.subr.bf16.mxu0 %v2724_v3 }
 0x135   : > { %v3840_v41 = vand.u32 4294901760, %v3185_v6 }
 0x137   : > { %2235 = vmatpush3.bf16.msra.mxu0 %v2234_v20  ;;  %v1109_v20 = vsub.f32 %v3156_v60, %v3850_v37  ;;  %v1137_v8 = vsub.f32 %v3185_v6, %v3840_v41 }
 0x138   : > { %2057 = vmatprep.subr.mxu0 %v2726_v21 }
 0x139   : > { %v1110_v43 = vand.u32 4294901760, %v1109_v20 }
 0x13b   : > { %2058 = vmatpush3.msra.mxu0 %v473_v32 }
 0x13c   : > { %2060 = vmatmul.mubr.f32.vlgmr.msra.gmra.mrb[0].mxu0 %v3006_v62  ;;  %2236 = vmatprep.subr.bf16.mxu0 %v2724_v3 }
 0x13d   : > { %2238 = vmatpush3.bf16.msra.mxu0 %v2237_v25  ;;  %2092 = vmatprep.mubr.msk.f32.mxu0 %vm2727_vm1, %v2726_v21 }
 0x13e   : > { %2239 = vmatprep.subr.bf16.mxu0 %v2724_v3 }
 0x141   : > { %2241 = vmatpush3.bf16.msra.mxu0 %v2240_v26  ;;  %v1123_v26 = vsub.f32 %v3160_v2, %v3844_v44 }
 0x142   : > { %2242 = vmatprep.subr.bf16.mxu0 %v2724_v3 }
 0x143   : > { %v1124_v56 = vand.u32 4294901760, %v1123_v26 }
 0x145   : > { %2244 = vmatpush3.bf16.msra.mxu0 %v2243_v33 }
 0x146   : > { %2245 = vmatprep.subr.bf16.mxu0 %v2724_v3 }
 0x149   : > { %2247 = vmatpush3.bf16.msra.mxu0 %v2246_v34  ;;  %v3200_v34 = vld [vmem:[%s3829_s3 + $0x40] sm:$0xff] }
 0x14a   : > { %2248 = vmatprep.subr.bf16.mxu0 %v2724_v3 }
 0x14d   : > { %2250 = vmatpush3.bf16.msra.mxu0 %v2249_v35 }
 0x14e   : > { %2251 = vmatprep.subr.bf16.mxu0 %v2724_v3 }
 0x151   : > { %2253 = vmatpush3.bf16.msra.mxu0 %v2252_v36 }
 0x152   : > { %2254 = vmatprep.subr.bf16.mxu0 %v2724_v3 }
 0x155   : > { %2256 = vmatpush3.bf16.msra.mxu0 %v2255_v40 }
 0x156   : > { %2090 = vmatprep.subr.mxu0 %v2726_v21 }
 0x159   : > { %2091 = vmatpush3.msra.mxu0 %v3017_v19  ;;  %v999_v19 = vand.u32 4294901760, %v3200_v34 }
 0x15a   : > { %2093 = vmatmul.mubr.f32.vlgmr.msra.gmra.mrb[0].mxu0 %v361_v63  ;;  %2257 = vmatprep.subr.bf16.mxu0 %v2724_v3  ;;  %v3212_v63 = vld [vmem:[%s3829_s3 + $0x50] sm:$0xff] }
 0x15b   : > { %2259 = vmatpush3.bf16.msra.mxu0 %v2832_v10  ;;  %2125 = vmatprep.mubr.msk.f32.mxu0 %vm2727_vm1, %v2726_v21 }
 0x15c   : > { %2260 = vmatprep.subr.bf16.mxu0 %v2724_v3 }
 0x15f   : > { %2262 = vmatpush3.bf16.msra.mxu0 %v2843_v16 }
 0x160   : > { %2263 = vmatprep.subr.bf16.mxu0 %v2724_v3 }
 0x163   : > { %2265 = vmatpush3.bf16.msra.mxu0 %v2857_v22 }
 0x164   : > { %2266 = vmatprep.subr.bf16.mxu0 %v2724_v3 }
 0x167   : > { %2268 = vmatpush3.bf16.msra.mxu0 %v2871_v29 }
 0x168   : > { %2269 = vmatprep.subr.bf16.mxu0 %v2724_v3 }
 0x16b   : > { %2271 = vmatpush3.bf16.msra.mxu0 %v2899_v46 }
 0x16c   : > { %2272 = vmatprep.subr.bf16.mxu0 %v2724_v3 }
 0x16f   : > { %2274 = vmatpush3.bf16.msra.mxu0 %v2910_v53 }
 0x170   : > { %2275 = vmatprep.subr.bf16.mxu0 %v2724_v3 }
 0x173   : > { %2277 = vmatpush3.bf16.msra.mxu0 %v2918_v57 }
 0x174   : > { %2123 = vmatprep.subr.mxu0 %v2726_v21 }
 0x177   : > { %2124 = vmatpush3.msra.mxu0 %v2930_v61 }
 0x178   : > { %2126 = vmatmul.mubr.f32.vlgmr.msra.gmra.mrb[0].mxu0 %v362_v7  ;;  %2278 = vmatprep.subr.bf16.mxu0 %v2724_v3 }
 0x179   : > { %2280 = vmatpush3.bf16.msra.mxu0 %v2279_v58  ;;  %2158 = vmatprep.mubr.msk.f32.mxu0 %vm2727_vm1, %v2726_v21  ;;  %v1002_v58 = vand.u32 4294901760, %v943_v42 }
 0x17a   : > { %2281 = vmatprep.subr.bf16.mxu0 %v2724_v3 }
 0x17d   : > { %2283 = vmatpush3.bf16.msra.mxu0 %v2282_v39  ;;  %v3233_v39 = vld [vmem:[%s3829_s3 + $0x68] sm:$0xff] }
 0x17e   : > { %2284 = vmatprep.subr.bf16.mxu0 %v2724_v3 }
 0x181   : > { %2286 = vmatpush3.bf16.msra.mxu0 %v2285_v11 }
 0x182   : > { %2287 = vmatprep.subr.bf16.mxu0 %v2724_v3 }
 0x185   : > { %2289 = vmatpush3.bf16.msra.mxu0 %v2288_v12  ;;  %v3237_v12 = vsub.f32 %v3200_v34, %v999_v19 }
 0x186   : > { %2290 = vmatprep.subr.bf16.mxu0 %v2724_v3 }
 0x187   : > { %v3839_v30 = vand.u32 4294901760, %v3237_v12 }
 0x189   : > { %2292 = vmatpush3.bf16.msra.mxu0 %v2291_v13  ;;  %v1144_v54 = vsub.f32 %v3237_v12, %v3839_v30 }
 0x18a   : > { %2293 = vmatprep.subr.bf16.mxu0 %v2724_v3 }
 0x18d   : > { %2295 = vmatpush3.bf16.msra.mxu0 %v2294_v15  ;;  %v1005_v15 = vand.u32 4294901760, %v3212_v63 }
 0x18e   : > { %2296 = vmatprep.subr.bf16.mxu0 %v2724_v3 }
 0x191   : > { %2298 = vmatpush3.bf16.msra.mxu0 %v2297_v23 }
 0x192   : > { %2156 = vmatprep.subr.mxu0 %v2726_v21 }
 0x195   : > { %2157 = vmatpush3.msra.mxu0 %v471_v5  ;;  %v3223_v5 = vld [vmem:[%s3829_s3 + $0x58] sm:$0xff] }
 0x196   : > { %2159 = vmatmul.mubr.f32.vlgmr.msra.gmra.mrb[0].mxu0 %v3006_v62  ;;  %2299 = vmatprep.subr.bf16.mxu0 %v2724_v3 }
 0x197   : > { %2301 = vmatpush3.bf16.msra.mxu0 %v2832_v10  ;;  %2191 = vmatprep.mubr.msk.f32.mxu0 %vm2727_vm1, %v2726_v21  ;;  %v934_v10 = vld [vmem:[%s3829_s3] sm:$0xff] }
 0x198   : > { %2302 = vmatprep.subr.bf16.mxu0 %v2724_v3  ;;  %v975_v24 = vand.u32 4294901760, %v934_v10 }
 0x19a   : > { %v3148_v55 = vsub.f32 %v934_v10, %v975_v24  ;;  %v3244_v10 = vsub.f32 %v943_v42, %v1002_v58  ;;  %v3308_v42 = vld [vmem:[%s3829_s3 + $0x80] sm:$0xff] }
 0x19b   : > { %2304 = vmatpush3.bf16.msra.mxu0 %v2843_v16  ;;  %v935_v16 = vld [vmem:[%s3829_s3 + $0x8] sm:$0xff] }
 0x19c   : > { %2305 = vmatprep.subr.bf16.mxu0 %v2724_v3  ;;  %v3857_v14 = vand.u32 4294901760, %v3148_v55 }
 0x19e   : > { %v1088_v50 = vsub.f32 %v3148_v55, %v3857_v14 }
 0x19f   : > { %2307 = vmatpush3.bf16.msra.mxu0 %v2857_v22  ;;  %v936_v22 = vld [vmem:[%s3829_s3 + $0x10] sm:$0xff] }
 0x1a0   : > { %2308 = vmatprep.subr.bf16.mxu0 %v2724_v3  ;;  %v981_v31 = vand.u32 4294901760, %v936_v22  ;;  %v1089_v35 = vand.u32 4294901760, %v1088_v50 }
 0x1a2   : > { %v3152_v59 = vsub.f32 %v936_v22, %v981_v31  ;;  %v3217_v9 = vpack.c.bf16 %v984_v48, %v981_v31  ;;  %v1011_v22 = vand.u32 4294901760, %v3228_v18  ;;  %v3255_v31 = vsub.f32 %v3212_v63, %v1005_v15 }
 0x1a3   : > { %2310 = vmatpush3.bf16.msra.mxu0 %v2871_v29  ;;  %v978_v29 = vand.u32 4294901760, %v935_v16  ;;  %v3838_v48 = vand.u32 4294901760, %v3244_v10  ;;  %v3319_v63 = vpack.c.bf16 %v1002_v58, %v999_v19  ;;  %v1023_v58 = vand.u32 4294901760, %v3308_v42 }
 0x1a4   : > { %2311 = vmatprep.subr.bf16.mxu0 %v2724_v3  ;;  %v3853_v27 = vand.u32 4294901760, %v3152_v59  ;;  %v3835_v50 = vand.u32 4294901760, %v3255_v31 }
 0x1a6   : > { %v1102_v1 = vsub.f32 %v3152_v59, %v3853_v27  ;;  %v962_v27 = vld [vmem:[%s3829_s3 + $0xe0] sm:$0xff] }
 0x1a7   : > { %2313 = vmatpush3.bf16.msra.mxu0 %v2899_v46  ;;  %v938_v46 = vld [vmem:[%s3829_s3 + $0x20] sm:$0xff] }
 0x1a8   : > { %2314 = vmatprep.subr.bf16.mxu0 %v2724_v3  ;;  %v987_v49 = vand.u32 4294901760, %v938_v46  ;;  %v1103_v40 = vand.u32 4294901760, %v1102_v1 }
 0x1aa   : > { %v2369_v32 = vpack.c.bf16 %v1110_v43, %v1103_v40  ;;  %v3239_v13 = vpack.c.bf16 %v990_v51, %v987_v49  ;;  %v3313_v43 = vld [vmem:[%s3829_s3 + $0x88] sm:$0xff] }
 0x1ab   : > { %2316 = vmatpush3.bf16.msra.mxu0 %v2910_v53  ;;  %v3141_v53 = vld [vmem:[%s3829_s3 + $0x30] sm:$0xff] }
 0x1ac   : > { %2317 = vmatprep.subr.bf16.mxu0 %v2724_v3  ;;  %v993_v4 = vand.u32 4294901760, %v3141_v53 }
 0x1ae   : > { %v3173_v45 = vsub.f32 %v3141_v53, %v993_v4  ;;  %v3267_v51 = vpack.c.bf16 %v996_v28, %v993_v4  ;;  %v3272_v53 = vsub.f32 %v3228_v18, %v1011_v22  ;;  %v1151_v28 = vsub.f32 %v3244_v10, %v3838_v48  ;;  %v3403_v18 = vld [vmem:[%s3829_s3 + $0xb8] sm:$0xff] }
 0x1af   : > { %2319 = vmatpush3.bf16.msra.mxu0 %v2918_v57  ;;  %v3150_v57 = vsub.f32 %v935_v16, %v978_v29  ;;  %v1008_v16 = vand.u32 4294901760, %v3223_v5 }
 0x1b0   : > { %2189 = vmatprep.subr.mxu0 %v2726_v21  ;;  %v3154_v21 = vpack.c.bf16 %v978_v29, %v975_v24  ;;  %v3843_v33 = vand.u32 4294901760, %v3173_v45  ;;  %v3251_v24 = vld [vmem:[%s3829_s3 + $0x70] sm:$0xff]  ;;  %v1138_v29 = vand.u32 4294901760, %v1137_v8  ;;  %v3833_v20 = vand.u32 4294901760, %v3272_v53 }
 0x1b1   : > { %v3856_v17 = vand.u32 4294901760, %v3150_v57  ;;  %v1017_v4 = vand.u32 4294901760, %v3251_v24 }
 0x1b2   : > { %v1172_v8 = vsub.f32 %v3272_v53, %v3833_v20  ;;  %v3348_v20 = vsub.f32 %v3308_v42, %v1023_v58 }
 0x1b3   : > { %2190 = vmatpush3.msra.mxu0 %v2930_v61  ;;  %v3158_v61 = vsub.f32 %v938_v46, %v987_v49  ;;  %v1095_v0 = vsub.f32 %v3150_v57, %v3856_v17  ;;  %v1014_v46 = vand.u32 4294901760, %v3233_v39  ;;  %v3265_v49 = vsub.f32 %v3223_v5, %v1008_v16 }
 0x1b4   : > { %2192 = vmatmul.mubr.f32.vlgmr.msra.gmra.mrb[0].mxu0 %v3006_v62  ;;  %2320 = vmatprep.subr.bf16.mxu0 %v2724_v3  ;;  %v1130_v62 = vsub.f32 %v3173_v45, %v3843_v33  ;;  %v3297_v34 = vsub.f32 %v3251_v24, %v1017_v4 }
 0x1b5   : > { %2322 = vmatpush1.bf16.msra.mxu0 %v3154_v21  ;;  %v3845_v38 = vand.u32 4294901760, %v3158_v61  ;;  %v1096_v36 = vand.u32 4294901760, %v1095_v0  ;;  %v3282_v0 = vsub.f32 %v3233_v39, %v1014_v46  ;;  %v3834_v1 = vand.u32 4294901760, %v3265_v49 }
 0x1b6   : > { %2323 = vmatprep.subr.bf16.mxu0 %v2724_v3  ;;  %v1131_v23 = vand.u32 4294901760, %v1130_v62  ;;  %v3837_v19 = vand.u32 4294901760, %v3297_v34 }
 0x1b7   : > { %v1116_v25 = vsub.f32 %v3158_v61, %v3845_v38  ;;  %v2366_v7 = vpack.c.bf16 %v1096_v36, %v1089_v35  ;;  %v3832_v26 = vand.u32 4294901760, %v3282_v0  ;;  %v1158_v36 = vsub.f32 %v3255_v31, %v3835_v50  ;;  %v3356_v50 = vld [vmem:[%s3829_s3 + $0xa0] sm:$0xff] }
 0x1b8   : > { %v2375_v35 = vpack.c.bf16 %v1138_v29, %v1131_v23  ;;  %v1165_v62 = vsub.f32 %v3265_v49, %v3834_v1  ;;  %v3341_v23 = vld [vmem:[%s3829_s3 + $0x98] sm:$0xff]  ;;  %v1186_v42 = vsub.f32 %v3297_v34, %v3837_v19 }
 0x1b9   : > { %v1117_v52 = vand.u32 4294901760, %v1116_v25  ;;  %2367 = vmatpush1.bf16.msra.mxu1 %v2366_v7  ;;  %2325 = vmatpush1.bf16.msra.mxu0 %v3217_v9  ;;  %v1020_v25 = vand.u32 4294901760, %v3261_v47  ;;  %v3324_v7 = vld [vmem:[%s3829_s3 + $0x90] sm:$0xff]  ;;  %v1179_v5 = vsub.f32 %v3282_v0, %v3832_v26  ;;  %v1159_v29 = vand.u32 4294901760, %v1158_v36 }
 0x1ba   : > { %2368 = vmatprep.subr.bf16.mxu1 %v2724_v3  ;;  %2326 = vmatprep.subr.bf16.mxu0 %v2724_v3  ;;  %v1166_v26 = vand.u32 4294901760, %v1165_v62 }
 0x1bb   : > { %v2372_v11 = vpack.c.bf16 %v1124_v56, %v1117_v52  ;;  %v3303_v40 = vsub.f32 %v3261_v47, %v1020_v25  ;;  %v1145_v52 = vand.u32 4294901760, %v1144_v54  ;;  %v1152_v56 = vand.u32 4294901760, %v1151_v28 }
 0x1bc   : > { %v3343_v47 = vpack.c.bf16 %v1008_v16, %v1005_v15  ;;  %v1029_v54 = vand.u32 4294901760, %v3324_v7  ;;  %v1032_v15 = vand.u32 4294901760, %v3341_v23  ;;  %v3364_v16 = vld [vmem:[%s3829_s3 + $0xa8] sm:$0xff]  ;;  %v1180_v36 = vand.u32 4294901760, %v1179_v5 }
 0x1bd   : > { %2370 = vmatpush1.bf16.msra.mxu1 %v2369_v32  ;;  %2328 = vmatpush1.bf16.msra.mxu0 %v3239_v13  ;;  %v3836_v32 = vand.u32 4294901760, %v3303_v40  ;;  %v2378_v28 = vpack.c.bf16 %v1152_v56, %v1145_v52  ;;  %v3842_v52 = vand.u32 4294901760, %v3348_v20  ;;  %v2381_v5 = vpack.c.bf16 %v1166_v26, %v1159_v29  ;;  %v3398_v26 = vld [vmem:[%s3829_s3 + $0xb0] sm:$0xff] }
 0x1be   : > { %2371 = vmatprep.subr.bf16.mxu1 %v2724_v3  ;;  %2329 = vmatprep.subr.bf16.mxu0 %v2724_v3  ;;  %v3377_v62 = vsub.f32 %v3324_v7, %v1029_v54  ;;  %v3390_v19 = vsub.f32 %v3341_v23, %v1032_v15  ;;  %v1038_v48 = vand.u32 4294901760, %v3364_v16  ;;  %v3407_v29 = vpack.c.bf16 %v1020_v25, %v1017_v4 }
 0x1bf   : > { %v3859_v25 = vand.u32 4294901760, %v3398_v26  ;;  %v1059_v7 = vand.u32 4294901760, %v962_v27 }
 0x1c0   : > { %v3847_v41 = vand.u32 4294901760, %v3377_v62  ;;  %v3846_v24 = vand.u32 4294901760, %v3390_v19  ;;  %v3426_v4 = vsub.f32 %v3364_v16, %v1038_v48  ;;  %v3863_v16 = vand.u32 4294901760, %v3398_v26 }
 0x1c1   : > { %2373 = vmatpush1.bf16.msra.mxu1 %v2372_v11  ;;  %2331 = vmatpush1.bf16.msra.mxu0 %v3267_v51  ;;  %v1026_v11 = vand.u32 4294901760, %v3313_v43  ;;  %v3536_v14 = vsub.f32 %v962_v27, %v1059_v7 }
 0x1c2   : > { %2374 = vmatprep.subr.bf16.mxu1 %v2724_v3  ;;  %2332 = vmatprep.subr.bf16.mxu0 %v2724_v3  ;;  %v1221_v44 = vsub.f32 %v3390_v19, %v3846_v24  ;;  %v3848_v38 = vand.u32 4294901760, %v3426_v4 }
 0x1c3   : > { %v3351_v1 = vsub.f32 %v3313_v43, %v1026_v11  ;;  %v1193_v43 = vsub.f32 %v3303_v40, %v3836_v32  ;;  %v3385_v32 = vpack.c.bf16 %v1014_v46, %v1011_v22  ;;  %v1187_v22 = vand.u32 4294901760, %v1186_v42 }
 0x1c5   : > { %2376 = vmatpush1.bf16.msra.mxu1 %v2375_v35  ;;  %2334 = vmatpush1.bf16.msra.mxu0 %v3319_v63  ;;  %v1173_v35 = vand.u32 4294901760, %v1172_v8  ;;  %v3841_v56 = vand.u32 4294901760, %v3351_v1  ;;  %v1035_v8 = vand.u32 4294901760, %v3356_v50  ;;  %v1194_v46 = vand.u32 4294901760, %v1193_v43 }
 0x1c6   : > { %2377 = vmatprep.subr.bf16.mxu1 %v2724_v3  ;;  %2335 = vmatprep.subr.bf16.mxu0 %v2724_v3  ;;  %v3432_v43 = vpack.c.bf16 %v1026_v11, %v1023_v58  ;;  %v3446_v58 = vsub.f32 %v3398_v26, %v3859_v25 }
 0x1c7   : > { %v2384_v39 = vpack.c.bf16 %v1180_v36, %v1173_v35  ;;  %v1207_v30 = vsub.f32 %v3351_v1, %v3841_v56  ;;  %v3419_v35 = vsub.f32 %v3356_v50, %v1035_v8  ;;  %v3858_v36 = vand.u32 4294901760, %v3403_v18 }
 0x1c8   : > { %v2387_v42 = vpack.c.bf16 %v1194_v46, %v1187_v22  ;;  %v1222_v46 = vand.u32 4294901760, %v1221_v44  ;;  %v3852_v24 = vand.u32 4294901760, %v3446_v58 }
 0x1c9   : > { %2379 = vmatpush1.bf16.msra.mxu1 %v2378_v28  ;;  %2337 = vmatpush1.bf16.msra.mxu0 %v3343_v47  ;;  %v1200_v28 = vsub.f32 %v3348_v20, %v3842_v52  ;;  %v1208_v56 = vand.u32 4294901760, %v1207_v30  ;;  %v1214_v52 = vsub.f32 %v3377_v62, %v3847_v41  ;;  %v3849_v33 = vand.u32 4294901760, %v3419_v35 }
 0x1ca   : > { %2380 = vmatprep.subr.bf16.mxu1 %v2724_v3  ;;  %2338 = vmatprep.subr.bf16.mxu0 %v2724_v3  ;;  %v3451_v30 = vsub.f32 %v3403_v18, %v3858_v36  ;;  %v1242_v44 = vsub.f32 %v3446_v58, %v3852_v24  ;;  %v3512_v24 = vpack.c.bf16 %v1032_v15, %v1029_v54 }
 0x1cb   : > { %v1228_v22 = vsub.f32 %v3419_v35, %v3849_v33 }
 0x1cc   : > { %v3851_v41 = vand.u32 4294901760, %v3451_v30  ;;  %v1243_v33 = vand.u32 4294901760, %v1242_v44 }
 0x1cd   : > { %2382 = vmatpush1.bf16.msra.mxu1 %v2381_v5  ;;  %2340 = vmatpush1.bf16.msra.mxu0 %v3385_v32  ;;  %v1201_v5 = vand.u32 4294901760, %v1200_v28  ;;  %v1235_v28 = vsub.f32 %v3426_v4, %v3848_v38 }
 0x1ce   : > { %2383 = vmatprep.subr.bf16.mxu1 %v2724_v3  ;;  %2341 = vmatprep.subr.bf16.mxu0 %v2724_v3 }
 0x1cf   : > { %v2390_v11 = vpack.c.bf16 %v1208_v56, %v1201_v5  ;;  %v1236_v5 = vand.u32 4294901760, %v1235_v28 }
 0x1d1   : > { %2385 = vmatpush1.bf16.msra.mxu1 %v2384_v39  ;;  %2343 = vmatpush1.bf16.msra.mxu0 %v3407_v29  ;;  %v1215_v39 = vand.u32 4294901760, %v1214_v52  ;;  %v1229_v52 = vand.u32 4294901760, %v1228_v22  ;;  %v959_v22 = vld [vmem:[%s3829_s3 + $0xc8] sm:$0xff] }
 0x1d2   : > { %2386 = vmatprep.subr.bf16.mxu1 %v2724_v3  ;;  %2344 = vmatprep.subr.bf16.mxu0 %v2724_v3  ;;  %v1050_v28 = vand.u32 4294901760, %v959_v22 }
 0x1d3   : > { %v2393_v56 = vpack.c.bf16 %v1222_v46, %v1215_v39  ;;  %v2396_v38 = vpack.c.bf16 %v1236_v5, %v1229_v52  ;;  %v958_v39 = vld [vmem:[%s3829_s3 + $0xc0] sm:$0xff] }
 0x1d4   : > { %v1047_v46 = vand.u32 4294901760, %v958_v39 }
 0x1d5   : > { %2388 = vmatpush1.bf16.msra.mxu1 %v2387_v42  ;;  %2346 = vmatpush1.bf16.msra.mxu0 %v3432_v43  ;;  %v1249_v42 = vsub.f32 %v3451_v30, %v3851_v41 }
 0x1d6   : > { %2389 = vmatprep.subr.bf16.mxu1 %v2724_v3  ;;  %2347 = vmatprep.subr.bf16.mxu0 %v2724_v3  ;;  %v3482_v52 = vsub.f32 %v958_v39, %v1047_v46 }
 0x1d7   : > { %v1250_v37 = vand.u32 4294901760, %v1249_v42 }
 0x1d9   : > { %2391 = vmatpush1.bf16.msra.mxu1 %v2390_v11  ;;  %v2399_v11 = vpack.c.bf16 %v1250_v37, %v1243_v33  ;;  %v3489_v37 = vld [vmem:[%s3829_s3 + $0xd0] sm:$0xff]  ;;  %v3854_v33 = vand.u32 4294901760, %v3482_v52  ;;  %2349 = vmatpush1.bf16.msra.mxu0 %v3512_v24 }
 0x1da   : > { %2392 = vmatprep.subr.bf16.mxu1 %v2724_v3  ;;  %v1053_v44 = vand.u32 4294901760, %v3489_v37  ;;  %2350 = vmatprep.subr.bf16.mxu0 %v2724_v3 }
 0x1dd   : > { %2394 = vmatpush1.bf16.msra.mxu1 %v2393_v56  ;;  %v3484_v56 = vsub.f32 %v959_v22, %v1050_v28  ;;  %v3504_v22 = vsub.f32 %v3489_v37, %v1053_v44 }
 0x1de   : > { %2395 = vmatprep.subr.bf16.mxu1 %v2724_v3 }
 0x1df   : > { %v3855_v5 = vand.u32 4294901760, %v3484_v56  ;;  %v1269_v37 = vand.u32 4294901760, %v3504_v22 }
 0x1e1   : > { %2397 = vmatpush1.bf16.msra.mxu1 %v2396_v38  ;;  %v961_v38 = vld [vmem:[%s3829_s3 + $0xd8] sm:$0xff]  ;;  %v1263_v39 = vsub.f32 %v3484_v56, %v3855_v5  ;;  %v1270_v15 = vsub.f32 %v3504_v22, %v1269_v37 }
 0x1e2   : > { %2398 = vmatprep.subr.bf16.mxu1 %v2724_v3  ;;  %v1056_v42 = vand.u32 4294901760, %v961_v38 }
 0x1e3   : > { %v1264_v17 = vand.u32 4294901760, %v1263_v39  ;;  %v3534_v39 = vpack.c.bf16 %v1038_v48, %v1035_v8  ;;  %v1271_v36 = vand.u32 4294901760, %v1270_v15  ;;  %v3864_v48 = vand.u32 4294901760, %v3403_v18 }
 0x1e4   : > { %v3506_v41 = vsub.f32 %v961_v38, %v1056_v42 }
 0x1e5   : > { %2400 = vmatpush1.bf16.msra.mxu1 %v2399_v11  ;;  %v1256_v11 = vsub.f32 %v3482_v52, %v3854_v33  ;;  %v963_v33 = vld [vmem:[%s3829_s3 + $0xe8] sm:$0xff]  ;;  %2352 = vmatpush1.bf16.msra.mxu0 %v3534_v39  ;;  %v3548_v27 = vpack.c.bf16 %v3864_v48, %v3863_v16 }
 0x1e6   : > { %2401 = vmatprep.subr.bf16.mxu1 %v2724_v3  ;;  %v1276_v38 = vand.u32 4294901760, %v3506_v41  ;;  %v1062_v23 = vand.u32 4294901760, %v963_v33  ;;  %2353 = vmatprep.subr.bf16.mxu0 %v2724_v3 }
 0x1e7   : > { %v1257_v5 = vand.u32 4294901760, %v1256_v11 }
 0x1e8   : > { %v1277_v11 = vsub.f32 %v3506_v41, %v1276_v38 }
 0x1e9   : > { %v2402_v54 = vpack.c.bf16 %v1264_v17, %v1257_v5  ;;  %v3538_v17 = vsub.f32 %v963_v33, %v1062_v23  ;;  %v3860_v5 = vand.u32 4294901760, %v3536_v14  ;;  %v1893_v33 = vld [vmem:[%s3828_s2] ss:$0 sm:$0xff]  ;;  %2355 = vmatpush1.bf16.msra.mxu0 %v3548_v27 }
 0x1ea   : > { %v1278_v25 = vand.u32 4294901760, %v1277_v11  ;;  %2356 = vmatprep.subr.bf16.mxu0 %v2724_v3 }
 0x1eb   : > { %2403 = vmatpush1.bf16.msra.mxu1 %v2402_v54  ;;  %v1290_v8 = vand.u32 4294901760, %v3538_v17  ;;  %v1284_v54 = vsub.f32 %v3536_v14, %v3860_v5 }
 0x1ec   : > { %2404 = vmatprep.subr.bf16.mxu1 %v2724_v3  ;;  %v2405_v50 = vpack.c.bf16 %v1278_v25, %v1271_v36  ;;  %v3562_v36 = vpack.c.bf16 %v1050_v28, %v1047_v46  ;;  %v3568_v28 = vpack.c.bf16 %v1056_v42, %v1053_v44 }
 0x1ed   : > { %v1291_v25 = vsub.f32 %v3538_v17, %v1290_v8  ;;  %v1285_v18 = vand.u32 4294901760, %v1284_v54 }
 0x1ee   : > { %2358 = vmatpush1.bf16.msra.mxu0 %v3562_v36 }
 0x1ef   : > { %2406 = vmatpush1.bf16.msra.mxu1 %v2405_v50  ;;  %v1292_v16 = vand.u32 4294901760, %v1291_v25  ;;  %2359 = vmatprep.subr.bf16.mxu0 %v2724_v3 }
 0x1f0   : > { %2407 = vmatprep.subr.bf16.mxu1 %v2724_v3 }
 0x1f1   : > { %v2408_v5 = vpack.c.bf16 %v1292_v16, %v1285_v18 }
 0x1f2   : > { %2361 = vmatpush1.bf16.msra.mxu0 %v3568_v28 }
 0x1f3   : > { %2409 = vmatpush1.bf16.msra.mxu1 %v2408_v5  ;;  %2362 = vmatprep.subr.bf16.mxu0 %v2724_v3 }
 0x1f4   : > { %2410 = vmatprep.subr.bf16.mxu1 %v2724_v3 }
 0x287   : > { %v904_v26 = vpop.f32.mrb[0].mxu0 }
 0x288   : > { %v2590_v15 = vadd.f32 %v1893_v33, %v904_v26  ;;  %v2193_v11 = vpop.f32.mrb[1].mxu0  ;;  %v3572_v33 = vpack.c.bf16 %v1062_v23, %v1059_v7  ;;  %v2411_v23 = vpack.c.bf16 %v3150_v57, %v3148_v55 }
 0x28a   : > { %v908_v48 = vmax.f32 %v2590_v15, 0.0  ;;  %2364 = vmatpush1.bf16.msra.mxu0 %v3572_v33 }
 0x28c   : > { %919 = vrot.lane.b32.xlu1 %v908_v48, %s2731_s10  ;;  %v926_v50 = vrot.slane %v908_v48, 1  ;;  %v913_v46 = vrot.slane %v908_v48, 7  ;;  %v2414_v48 = vpack.c.bf16 %v3156_v60, %v3152_v59  ;;  %s2666_s10 = scalar_lea.vmem %s2665_s9, 256 }
 0x28d   : > { %p2668_p1 = scmp.lt.s32.totalorder %s2666_s10, %s2660_s8 }
 0x28e   : > { %927 = vrot.lane.b32.xlu0 %v926_v50, %s2732_s11 }
 0x28f   : > { %p2669_p2 = por %p2668_p1, %p2667_p0 }
 0x290   : > { %914 = vrot.lane.b32.xlu1 %v913_v46, %s2733_s12 }
 0x291   : > { %p2670_p3 = pnand %p2669_p2, %p2663_p13 }
 0x2fe   : > { %v920_v5 = vpop.permute.xlu1 %919 }
 0x2ff   : > { %925 = vst.msk [vmem:[#allocation3 + $0x8] sm:$0xff] %vm924_vm6, %v920_v5 }
 0x300   : > { %v928_v54 = vpop.permute.xlu0 %927 }
 0x301   : > { %931 = vst.msk [vmem:[#allocation3 + $0x8] sm:$0x7f] %vm930_vm7, %v928_v54 }
 0x302   : > { %v915_v44 = vpop.permute.xlu1 %914 }
 0x303   : > { %918 = vst.msk [vmem:[#allocation3] sm:$0xfe] %vm917_vm8, %v915_v44  ;;  %v2417_v44 = vpack.c.bf16 %v3160_v2, %v3158_v61 }
 0x304   : > { %923 = vst.msk [vmem:[#allocation3] sm:$0xff] %vm922_vm9, %v920_v5 }
 0x308   : > { %v933_v42 = vld [vmem:[#allocation3 + $0x8] sm:$0xff] }
 0x309   : > { %v972_v25 = vsel %vm910_vm5, %v933_v42, 0 }
 0x30a   : > { %v3576_v26 = vand.u32 4294901760, %v972_v25 }
 0x30b   : > { %v932_v7 = vld [vmem:[#allocation3] sm:$0xff] }
 0x30c   : > { %1299 = vmatprep.mubr.f32.mxu1 %v3576_v26  ;;  %v3581_v18 = vand.u32 4294901760, %v932_v7  ;;  %v1069_v15 = vsub.f32 %v972_v25, %v3576_v26  ;;  %v2420_v25 = vpack.c.bf16 %v3185_v6, %v3173_v45 }
 0x30e   : > { %v3585_v11 = vsub.f32 %v932_v7, %v3581_v18  ;;  %1301 = vmatmul.mubr.f32.vlgmr.msra.gmra.mrb[0].mxu1 %v3581_v18  ;;  %v1070_v16 = vand.u32 4294901760, %v1069_v15  ;;  %v2423_v7 = vpack.c.bf16 %v3244_v10, %v3237_v12 }
 0x30f   : > { %2412 = vmatpush1.bf16.msra.mxu1 %v2411_v23  ;;  %1432 = vmatprep.mubr.f32.mxu1 %v1069_v15  ;;  %v2426_v23 = vpack.c.bf16 %v3265_v49, %v3255_v31 }
 0x310   : > { %2413 = vmatprep.subr.bf16.mxu1 %v2724_v3  ;;  %v1071_v50 = vsub.f32 %v1069_v15, %v1070_v16  ;;  %v1076_v46 = vand.u32 4294901760, %v3585_v11  ;;  %v2429_v15 = vpack.c.bf16 %v3282_v0, %v3272_v53 }
 0x312   : > { %v1072_v5 = vand.u32 4294901760, %v1071_v50  ;;  %v1077_v54 = vsub.f32 %v3585_v11, %v1076_v46  ;;  %v2435_v50 = vpack.c.bf16 %v3351_v1, %v3348_v20 }
 0x313   : > { %2415 = vmatpush1.bf16.msra.mxu1 %v2414_v48  ;;  %v2432_v48 = vpack.c.bf16 %v3303_v40, %v3297_v34 }
 0x314   : > { %1073 = vmatprep.mubr.f32.mxu0 %v1072_v5  ;;  %2416 = vmatprep.subr.bf16.mxu1 %v2724_v3  ;;  %v1078_v42 = vand.u32 4294901760, %v1077_v54  ;;  %v2438_v5 = vpack.c.bf16 %v3390_v19, %v3377_v62  ;;  %v2441_v54 = vpack.c.bf16 %v3426_v4, %v3419_v35 }
 0x316   : > { %1079 = vmatmul.mubr.f32.vlgmr.msra.gmra.mrb[2].mxu0 %v1078_v42  ;;  %v2447_v42 = vpack.c.bf16 %v3484_v56, %v3482_v52 }
 0x317   : > { %2418 = vmatpush1.bf16.msra.mxu1 %v2417_v44  ;;  %v2444_v44 = vpack.c.bf16 %v3451_v30, %v3446_v58 }
 0x318   : > { %2419 = vmatprep.subr.bf16.mxu1 %v2724_v3 }
 0x31b   : > { %2421 = vmatpush1.bf16.msra.mxu1 %v2420_v25  ;;  %v2450_v25 = vpack.c.bf16 %v3506_v41, %v3504_v22  ;;  %v1894_v41 = vld [vmem:[%s3830_s4] ss:$0 sm:$0xff] }
 0x31c   : > { %2422 = vmatprep.subr.bf16.mxu1 %v2724_v3 }
 0x31f   : > { %2424 = vmatpush1.bf16.msra.mxu1 %v2423_v7  ;;  %v2453_v7 = vpack.c.bf16 %v3538_v17, %v3536_v14 }
 0x320   : > { %2425 = vmatprep.subr.bf16.mxu1 %v2724_v3 }
 0x323   : > { %2427 = vmatpush1.bf16.msra.mxu1 %v2426_v23  ;;  %v3866_v23 = vand.u32 4294901760, %v3150_v57  ;;  %v3870_v57 = vand.u32 4294901760, %v3160_v2  ;;  %v3876_v2 = vand.u32 4294901760, %v3265_v49  ;;  %v3882_v49 = vand.u32 4294901760, %v3351_v1 }
 0x324   : > { %2428 = vmatprep.subr.bf16.mxu1 %v2724_v3  ;;  %v3887_v1 = vand.u32 4294901760, %v3446_v58 }
 0x327   : > { %2430 = vmatpush1.bf16.msra.mxu1 %v2429_v15 }
 0x328   : > { %2431 = vmatprep.subr.bf16.mxu1 %v2724_v3 }
 0x32b   : > { %2433 = vmatpush1.bf16.msra.mxu1 %v2432_v48  ;;  %v3867_v48 = vand.u32 4294901760, %v3152_v59  ;;  %v3873_v59 = vand.u32 4294901760, %v3237_v12  ;;  %v3879_v12 = vand.u32 4294901760, %v3297_v34  ;;  %v3885_v34 = vand.u32 4294901760, %v3419_v35 }
 0x32c   : > { %2434 = vmatprep.subr.bf16.mxu1 %v2724_v3  ;;  %v2540_v35 = vpack.c.bf16 %v1276_v38, %v1269_v37 }
 0x32f   : > { %2436 = vmatpush1.bf16.msra.mxu1 %v2435_v50  ;;  %v3868_v50 = vand.u32 4294901760, %v3156_v60  ;;  %v3874_v60 = vand.u32 4294901760, %v3244_v10  ;;  %v3880_v10 = vand.u32 4294901760, %v3303_v40  ;;  %v3886_v40 = vand.u32 4294901760, %v3426_v4 }
 0x330   : > { %2437 = vmatprep.subr.bf16.mxu1 %v2724_v3  ;;  %v3891_v4 = vand.u32 4294901760, %v3536_v14 }
 0x332   : > { %v2543_v58 = vpack.c.bf16 %v1290_v8, %v3891_v4 }
 0x333   : > { %2439 = vmatpush1.bf16.msra.mxu1 %v2438_v5  ;;  %v2504_v5 = vpack.c.bf16 %v3868_v50, %v3867_v48  ;;  %v2531_v48 = vpack.c.bf16 %v3886_v40, %v3885_v34 }
 0x334   : > { %2440 = vmatprep.subr.bf16.mxu1 %v2724_v3 }
 0x337   : > { %2442 = vmatpush1.bf16.msra.mxu1 %v2441_v54 }
 0x338   : > { %2443 = vmatprep.subr.bf16.mxu1 %v2724_v3 }
 0x33b   : > { %2445 = vmatpush1.bf16.msra.mxu1 %v2444_v44 }
 0x33c   : > { %2446 = vmatprep.subr.bf16.mxu1 %v2724_v3 }
 0x33f   : > { %2448 = vmatpush1.bf16.msra.mxu1 %v2447_v42  ;;  %v2513_v42 = vpack.c.bf16 %v3874_v60, %v3873_v59 }
 0x340   : > { %2449 = vmatprep.subr.bf16.mxu1 %v2724_v3 }
 0x343   : > { %2451 = vmatpush1.bf16.msra.mxu1 %v2450_v25 }
 0x344   : > { %2452 = vmatprep.subr.bf16.mxu1 %v2724_v3 }
 0x347   : > { %2454 = vmatpush1.bf16.msra.mxu1 %v2453_v7 }
 0x348   : > { %2455 = vmatprep.subr.bf16.mxu1 %v2724_v3 }
 0x34a   : > { %1435 = vmatmul.mubr.f32.vlgmr.msra.gmra.mrb[0].mxu1 %v3585_v11  ;;  %v3871_v11 = vand.u32 4294901760, %v3173_v45  ;;  %v3877_v45 = vand.u32 4294901760, %v3272_v53  ;;  %v3883_v53 = vand.u32 4294901760, %v3377_v62  ;;  %v3890_v62 = vand.u32 4294901760, %v3484_v56 }
 0x34b   : > { %2457 = vmatpush1.bf16.msra.mxu1 %v3154_v21  ;;  %1537 = vmatprep.mubr.f32.mxu1 %v1070_v16  ;;  %v3865_v16 = vand.u32 4294901760, %v3148_v55  ;;  %v3869_v55 = vand.u32 4294901760, %v3158_v61  ;;  %v3875_v61 = vand.u32 4294901760, %v3255_v31  ;;  %v3881_v31 = vand.u32 4294901760, %v3348_v20 }
 0x34c   : > { %2458 = vmatprep.subr.bf16.mxu1 %v2724_v3  ;;  %v3888_v20 = vand.u32 4294901760, %v3451_v30 }
 0x34d   : > { %v2501_v15 = vpack.c.bf16 %v3866_v23, %v3865_v16  ;;  %v2507_v54 = vpack.c.bf16 %v3870_v57, %v3869_v55  ;;  %v2516_v25 = vpack.c.bf16 %v3876_v2, %v3875_v61  ;;  %v2522_v16 = vpack.c.bf16 %v3880_v10, %v3879_v12 }
 0x34e   : > { %v2525_v23 = vpack.c.bf16 %v3882_v49, %v3881_v31  ;;  %v2534_v50 = vpack.c.bf16 %v3888_v20, %v3887_v1 }
 0x34f   : > { %2460 = vmatpush1.bf16.msra.mxu1 %v3217_v9 }
 0x350   : > { %2461 = vmatprep.subr.bf16.mxu1 %v2724_v3 }
 0x353   : > { %2463 = vmatpush1.bf16.msra.mxu1 %v3239_v13 }
 0x354   : > { %2464 = vmatprep.subr.bf16.mxu1 %v2724_v3 }
 0x357   : > { %2466 = vmatpush1.bf16.msra.mxu1 %v3267_v51 }
 0x358   : > { %2467 = vmatprep.subr.bf16.mxu1 %v2724_v3 }
 0x35b   : > { %2469 = vmatpush1.bf16.msra.mxu1 %v3319_v63 }
 0x35c   : > { %2470 = vmatprep.subr.bf16.mxu1 %v2724_v3 }
 0x35f   : > { %2472 = vmatpush1.bf16.msra.mxu1 %v3343_v47 }
 0x360   : > { %2473 = vmatprep.subr.bf16.mxu1 %v2724_v3 }
 0x363   : > { %2475 = vmatpush1.bf16.msra.mxu1 %v3385_v32 }
 0x364   : > { %2476 = vmatprep.subr.bf16.mxu1 %v2724_v3 }
 0x367   : > { %2478 = vmatpush1.bf16.msra.mxu1 %v3407_v29 }
 0x368   : > { %2479 = vmatprep.subr.bf16.mxu1 %v2724_v3 }
 0x36b   : > { %2481 = vmatpush1.bf16.msra.mxu1 %v3432_v43 }
 0x36c   : > { %2482 = vmatprep.subr.bf16.mxu1 %v2724_v3 }
 0x36f   : > { %2484 = vmatpush1.bf16.msra.mxu1 %v3512_v24 }
 0x370   : > { %2485 = vmatprep.subr.bf16.mxu1 %v2724_v3 }
 0x373   : > { %2487 = vmatpush1.bf16.msra.mxu1 %v3534_v39 }
 0x374   : > { %2488 = vmatprep.subr.bf16.mxu1 %v2724_v3 }
 0x377   : > { %2490 = vmatpush1.bf16.msra.mxu1 %v3548_v27 }
 0x378   : > { %2491 = vmatprep.subr.bf16.mxu1 %v2724_v3 }
 0x37b   : > { %2493 = vmatpush1.bf16.msra.mxu1 %v3562_v36 }
 0x37c   : > { %2494 = vmatprep.subr.bf16.mxu1 %v2724_v3 }
 0x37f   : > { %2496 = vmatpush1.bf16.msra.mxu1 %v3568_v28 }
 0x380   : > { %2497 = vmatprep.subr.bf16.mxu1 %v2724_v3 }
 0x383   : > { %2499 = vmatpush1.bf16.msra.mxu1 %v3572_v33 }
 0x384   : > { %2500 = vmatprep.subr.bf16.mxu1 %v2724_v3 }
 0x386   : > { %1541 = vmatmul.mubr.f32.vlgmr.msra.gmra.mrb[0].mxu1 %v1076_v46  ;;  %v3872_v46 = vand.u32 4294901760, %v3185_v6  ;;  %v3878_v6 = vand.u32 4294901760, %v3282_v0  ;;  %v3884_v0 = vand.u32 4294901760, %v3390_v19  ;;  %v3889_v19 = vand.u32 4294901760, %v3482_v52 }
 0x387   : > { %2502 = vmatpush1.bf16.msra.mxu1 %v2501_v15  ;;  %1701 = vmatprep.mubr.f32.mxu1 %v3576_v26 }
 0x388   : > { %2503 = vmatprep.subr.bf16.mxu1 %v2724_v3  ;;  %v2510_v44 = vpack.c.bf16 %v3872_v46, %v3871_v11  ;;  %v2519_v7 = vpack.c.bf16 %v3878_v6, %v3877_v45  ;;  %v2528_v15 = vpack.c.bf16 %v3884_v0, %v3883_v53 }
 0x38b   : > { %2505 = vmatpush1.bf16.msra.mxu1 %v2504_v5  ;;  %v2537_v5 = vpack.c.bf16 %v3890_v62, %v3889_v19 }
 0x38c   : > { %2506 = vmatprep.subr.bf16.mxu1 %v2724_v3 }
 0x38f   : > { %2508 = vmatpush1.bf16.msra.mxu1 %v2507_v54 }
 0x390   : > { %2509 = vmatprep.subr.bf16.mxu1 %v2724_v3 }
 0x393   : > { %2511 = vmatpush1.bf16.msra.mxu1 %v2510_v44 }
 0x394   : > { %2512 = vmatprep.subr.bf16.mxu1 %v2724_v3 }
 0x397   : > { %2514 = vmatpush1.bf16.msra.mxu1 %v2513_v42 }
 0x398   : > { %2515 = vmatprep.subr.bf16.mxu1 %v2724_v3 }
 0x39b   : > { %2517 = vmatpush1.bf16.msra.mxu1 %v2516_v25 }
 0x39c   : > { %2518 = vmatprep.subr.bf16.mxu1 %v2724_v3 }
 0x39f   : > { %2520 = vmatpush1.bf16.msra.mxu1 %v2519_v7 }
 0x3a0   : > { %2521 = vmatprep.subr.bf16.mxu1 %v2724_v3 }
 0x3a3   : > { %2523 = vmatpush1.bf16.msra.mxu1 %v2522_v16 }
 0x3a4   : > { %2524 = vmatprep.subr.bf16.mxu1 %v2724_v3 }
 0x3a7   : > { %2526 = vmatpush1.bf16.msra.mxu1 %v2525_v23 }
 0x3a8   : > { %2527 = vmatprep.subr.bf16.mxu1 %v2724_v3 }
 0x3ab   : > { %2529 = vmatpush1.bf16.msra.mxu1 %v2528_v15 }
 0x3ac   : > { %2530 = vmatprep.subr.bf16.mxu1 %v2724_v3 }
 0x3af   : > { %2532 = vmatpush1.bf16.msra.mxu1 %v2531_v48 }
 0x3b0   : > { %2533 = vmatprep.subr.bf16.mxu1 %v2724_v3 }
 0x3b3   : > { %2535 = vmatpush1.bf16.msra.mxu1 %v2534_v50 }
 0x3b4   : > { %2536 = vmatprep.subr.bf16.mxu1 %v2724_v3 }
 0x3b7   : > { %2538 = vmatpush1.bf16.msra.mxu1 %v2537_v5 }
 0x3b8   : > { %2539 = vmatprep.subr.bf16.mxu1 %v2724_v3 }
 0x3bb   : > { %2541 = vmatpush1.bf16.msra.mxu1 %v2540_v35 }
 0x3bc   : > { %2542 = vmatprep.subr.bf16.mxu1 %v2724_v3 }
 0x3bf   : > { %2544 = vmatpush1.bf16.msra.mxu1 %v2543_v58 }
 0x3c0   : > { %2545 = vmatprep.subr.bf16.mxu1 %v2724_v3 }
 0x3c2   : > { %1703 = vmatmul.mubr.f32.vlgmr.msra.gmra.mrb[0].mxu1 %v3581_v18 }
 0x3c3   : > { %2547 = vmatpush1.bf16.msra.mxu1 %v3154_v21  ;;  %1803 = vmatprep.mubr.f32.mxu1 %v3576_v26 }
 0x3c4   : > { %2548 = vmatprep.subr.bf16.mxu1 %v2724_v3 }
 0x3c7   : > { %2550 = vmatpush1.bf16.msra.mxu1 %v3217_v9 }
 0x3c8   : > { %2551 = vmatprep.subr.bf16.mxu1 %v2724_v3 }
 0x3cb   : > { %2553 = vmatpush1.bf16.msra.mxu1 %v3239_v13 }
 0x3cc   : > { %2554 = vmatprep.subr.bf16.mxu1 %v2724_v3 }
 0x3cf   : > { %2556 = vmatpush1.bf16.msra.mxu1 %v3267_v51 }
 0x3d0   : > { %2557 = vmatprep.subr.bf16.mxu1 %v2724_v3 }
 0x3d3   : > { %2559 = vmatpush1.bf16.msra.mxu1 %v3319_v63 }
 0x3d4   : > { %2560 = vmatprep.subr.bf16.mxu1 %v2724_v3 }
 0x3d7   : > { %2562 = vmatpush1.bf16.msra.mxu1 %v3343_v47 }
 0x3d8   : > { %2563 = vmatprep.subr.bf16.mxu1 %v2724_v3 }
 0x3db   : > { %2565 = vmatpush1.bf16.msra.mxu1 %v3385_v32 }
 0x3dc   : > { %2566 = vmatprep.subr.bf16.mxu1 %v2724_v3 }
 0x3df   : > { %2568 = vmatpush1.bf16.msra.mxu1 %v3407_v29 }
 0x3e0   : > { %2569 = vmatprep.subr.bf16.mxu1 %v2724_v3 }
 0x3e3   : > { %2571 = vmatpush1.bf16.msra.mxu1 %v3432_v43 }
 0x3e4   : > { %2572 = vmatprep.subr.bf16.mxu1 %v2724_v3 }
 0x3e7   : > { %2574 = vmatpush1.bf16.msra.mxu1 %v3512_v24 }
 0x3e8   : > { %2575 = vmatprep.subr.bf16.mxu1 %v2724_v3 }
 0x3e9   : > { %v1080_v21 = vpop.f32.mrb[2].mxu0 }
 0x3ea   : > { %v1082_v14 = vpop.f32.mrb[3].mxu0  ;;  %v1081_v9 = vadd.f32 %v1894_v41, %v1080_v21 }
 0x3eb   : > { %2577 = vmatpush1.bf16.msra.mxu1 %v3534_v39 }
 0x3ec   : > { %2578 = vmatprep.subr.bf16.mxu1 %v2724_v3 }
 0x3ef   : > { %2580 = vmatpush1.bf16.msra.mxu1 %v3548_v27 }
 0x3f0   : > { %2581 = vmatprep.subr.bf16.mxu1 %v2724_v3 }
 0x3f3   : > { %2583 = vmatpush1.bf16.msra.mxu1 %v3562_v36 }
 0x3f4   : > { %2584 = vmatprep.subr.bf16.mxu1 %v2724_v3 }
 0x3f7   : > { %2586 = vmatpush1.bf16.msra.mxu1 %v3568_v28 }
 0x3f8   : > { %2587 = vmatprep.subr.bf16.mxu1 %v2724_v3 }
 0x3fb   : > { %2589 = vmatpush1.bf16.msra.mxu1 %v3572_v33 }
 0x3fe   : > { %1805 = vmatmul.mubr.f32.vlgmr.msra.gmra.mrb[0].mxu1 %v3581_v18 }
 0x4d1   : > { %v1806_v13 = vpop.f32.mrb[0].mxu1 }
 0x4d2   : > { %v2592_v51 = vadd.f32 %v1806_v13, %v1081_v9  ;;  %v1808_v63 = vpop.f32.mrb[1].mxu1 }
 0x4d4   : > { %v1810_v3 = vmax.f32 %v2592_v51, 0.0 }
 0x4d6   : > { %1812 = vst.msk [vmem:[%s217_s23] sm:$0xff] %vm1811_vm10, %v1810_v3 }
 0x4d7   : > { %2673 = shalt.err (!%p2670_p3)
}
 0x4d8   : > { %s2674_s11 = scalar_lea.hbm %s3784_s6, 128  ;;  %s2678_s14 = scalar_lea.hbm %s3831_s5, 256 }
 0x4d9   : > { %p2675_p4 = scmp.ne.s32.totalorder %s3784_s6, %s2674_s11  ;;  %p2679_p9 = scmp.lt.u32.totalorder %s3784_s6, %s3831_s5 }
 0x4da   : > { %p2680_p10 = scmp.lt.u32.totalorder %s2678_s14, %s2674_s11  ;;  %p2682_p12 = scmp.lt.u32.totalorder %s2674_s11, %s3784_s6 }
 0x4db   : > { %p2676_p7 = pnand %p2675_p4, %p2803_p5 }
 0x4dc   : > { %p2681_p11 = por %p2680_p10, %p2679_p9 }
 0x4dd   : > { %p2677_p8 = pneg %p2676_p7 }
 0x4de   : > { %p2683_p13 = por %p2682_p12, %p2681_p11 }
 0x4e0   : > { %p2684_p0 = pnand %p2683_p13, %p2677_p8 }
 0x4e2   : > { %2687 = shalt.err (!%p2684_p0)
}
 0x4e3   : > { %2611 = dma.vmem_to_hbm [thread:$0]  (%p2803_p5), %s3786_s25, 128, %s3784_s6, %s1814_s7  }
 0x4e4 PF: > { %p2617_p1 = scmp.ge.s32.totalorder %s2722_s21, 2  ;;  %s1839_s17 = sand.u32 1, %s2710_s18  }
 0x4e5   : > { %s1840_s23 = scalar_lea.sflag [#allocation5], %s1839_s17 }
 0x4e6   : > { %p2614_p2 = pnand %p2617_p1, %p2807_p6 }
 0x4e8   : > { %2705 = dma.done.wait (!%p2614_p2), %s1840_s23, 128  }
 0x4e9   : > { %2707 = vsyncadd (!%p2614_p2), %s1840_s23, 4294967168  ;;  %p15_p3 = scmp.ge.s32.totalorder %s2790_s24, 4   ;;  %s3892_s18 = smov %s2714_s19 }
 0x4ea   : > { %s3893_s19 = smov %s2718_s20  ;;  %s3894_s20 = smov %s2801_s27 }
 0x4eb   : > { %s3895_s21 = smov %s2790_s24  ;;  %17 = sbr.rel (!%p15_p3) target bundleno = 3 (0x3), region = 75 }
 0x4f2   :  { %1845 = vsyncpa [#allocation5], 1 }
 0x4f3   :  { %1847 = vsyncpa [#allocation5 + $0x1], 1 }

</bundles_post_ra>
